<compile_context>
chip_gen: v5e
topology: v5e:2x2
jax: 0.10.0
libtpu: 0.0.40
codegen_flags: <defaults>
</compile_context>

<pallas_src>
import jax
import jax.numpy as jnp
from jax.experimental import pallas as pl
from jax.experimental.pallas import tpu as pltpu

# ---- Model dimensions (dim <= 16 branch) ----
N = 16           # nodes per graph-batch
D = 8            # input feature dim
H = 20           # GATConv hidden dim
G = 2            # graphs per graph-batch
OUT = 2          # output classes
BB = 8           # graph-batches packed per grid step
BBN = BB * N     # 128 nodes per packed step (sublane-dense, lane-dense softmax)
BBG = BB * G     # 16 graphs per packed step
LANES = 128
EPS = 1e-5
NEG_SLOPE = 0.2  # GATConv default LeakyReLU slope

# ---- Per-step input-slab row offsets (all sections 8-row aligned) ----
IN_R_ADJ = 0          # rows [0, 128):   block-diagonal adjacency  [128, 128]
IN_R_X = 128          # rows [128, 256): node features, lanes 0:D  [128, 128]
IN_R_POOL = 256       # rows [256, 272): block-diag mean-pool      [16, 128]
IN_ROWS = 272

# ---- Parameter-slab row offsets (all sections 8-row aligned, full 128 lanes) ----
P_R_WGAT = 0          # rows [0, 128):   BN1-folded GATConv weight, rows 0:D, lanes 0:H
P_R_ATT = 128         # rows [128, 256): lane0 = att_dst, lane1 = att_src (rows 0:H)
P_R_WLIN = 256        # rows [256, 384): BN2-folded Linear weight, rows 0:H, lanes 0:OUT
P_R_BH = 384          # row 384: BN1-folded pre-attention bias  [1, 128]
P_R_GATB = 392        # row 392: GATConv output bias            [1, 128]
P_R_BLIN = 400        # row 400: BN2-folded Linear bias         [1, 128]
P_ROWS = 408


def gat_block_kernel(in_ref, p_ref, out_ref):
    # --- one fused input DMA per step; static, aligned, full-lane slices ---
    adj = in_ref[IN_R_ADJ:IN_R_ADJ + BBN, :]        # [128, 128] block-diag, adj[i,j]=1 iff edge j->i
    x = in_ref[IN_R_X:IN_R_X + BBN, :]              # [128, 128] (lanes 0:D real, rest 0)
    pool = in_ref[IN_R_POOL:IN_R_POOL + BBG, :]     # [16, 128]  block-diag mean-pool

    w_gat = p_ref[P_R_WGAT:P_R_WGAT + LANES, :]     # [128, 128]
    att = p_ref[P_R_ATT:P_R_ATT + LANES, :]         # [128, 128]
    w_lin = p_ref[P_R_WLIN:P_R_WLIN + LANES, :]     # [128, 128]
    b_h = p_ref[P_R_BH:P_R_BH + 1, :]               # [1, 128]
    gat_b = p_ref[P_R_GATB:P_R_GATB + 1, :]         # [1, 128]
    b_lin = p_ref[P_R_BLIN:P_R_BLIN + 1, :]         # [1, 128]

    # --- BatchNorm(D) + GATConv linear (folded): h = BN(x) @ W + (t1 @ W) ---
    h = jnp.dot(x, w_gat, preferred_element_type=jnp.float32) + b_h        # [128, 128]

    # --- Attention logits: one [128,128]x[128,128] matmul gives dst (lane 0) & src (lane 1) ---
    a_both = jnp.dot(h, att, preferred_element_type=jnp.float32)           # [128, 128]
    a_dst = a_both[:, 0:1]                                                  # [128, 1]
    a_src = a_both.T[1:2, :]      # one aligned 128x128 XLU transpose per packed step  [1, 128]

    e = a_dst + a_src                              # e[i, j] = a_dst[i] + a_src[j]
    e = jnp.where(e > 0, e, NEG_SLOPE * e)         # LeakyReLU(0.2)
    e = jnp.where(adj > 0, e, jnp.float32(-1e30))  # block-diagonal neighbor mask (incl. self loops)

    # --- Masked row-softmax over incoming edges (full 128 lanes of real work) ---
    e_max = jnp.max(e, axis=1, keepdims=True)
    p = jnp.exp(e - e_max)                         # masked entries underflow to exactly 0
    denom = jnp.sum(p, axis=1, keepdims=True)      # >= 1 thanks to self loops
    attn = p / denom                               # exact normalization (torch parity)

    # --- Aggregate messages (bf16 MXU, f32 accumulate) + GATConv bias ---
    msg = jnp.dot(attn.astype(jnp.bfloat16), h.astype(jnp.bfloat16),
                  preferred_element_type=jnp.float32) + gat_b              # [128, 128]

    # --- ELU ---
    act = jnp.where(msg > 0, msg, jnp.exp(jnp.minimum(msg, 0.0)) - 1.0)

    # --- global_mean_pool for all 16 graphs of the packed step ---
    pooled = jnp.dot(pool, act, preferred_element_type=jnp.float32)        # [16, 128]

    # --- BatchNorm(H) + Dropout(identity) + Linear(H, 2), folded; lane-dense store ---
    out_ref[...] = (jnp.dot(pooled, w_lin, preferred_element_type=jnp.float32)
                    + b_lin)                                                # [16, 128]


@jax.jit
def gat_forward(in_slab, param_slab):
    """in_slab: [B//BB, 272, 128], param_slab: [408, 128] -> logits [B, G, OUT]."""
    S = in_slab.shape[0]
    out = pl.pallas_call(
        gat_block_kernel,
        out_shape=jax.ShapeDtypeStruct((S * BBG, LANES), jnp.float32),
        grid_spec=pltpu.PrefetchScalarGridSpec(
            num_scalar_prefetch=0,
            grid=(S,),
            in_specs=[
                pl.BlockSpec((None, IN_ROWS, LANES), lambda s: (s, 0, 0)),
                pl.BlockSpec((P_ROWS, LANES), lambda s: (0, 0)),   # resident param slab
            ],
            out_specs=pl.BlockSpec((BBG, LANES), lambda s: (s, 0)),
        ),
        compiler_params=pltpu.CompilerParams(
            dimension_semantics=("parallel",)),
    )(in_slab, param_slab)
    return out[:, :OUT].reshape(S * BB, G, OUT)


def pack_params(p):
    """Fold eval-mode BatchNorms into adjacent linears; pack into one full-lane [408,128] slab."""
    s1 = p["bn1_g"] * jax.lax.rsqrt(p["bn1_rv"] + EPS)          # [D]
    t1 = p["bn1_b"] - p["bn1_rm"] * s1                          # [D]
    w_gat_f = p["w_gat"] * s1[:, None]                          # [D, H]
    b_h = t1 @ p["w_gat"]                                       # [H]
    s2 = p["bn2_g"] * jax.lax.rsqrt(p["bn2_rv"] + EPS)          # [H]
    t2 = p["bn2_b"] - p["bn2_rm"] * s2                          # [H]
    w_lin_f = p["w_lin"] * s2[:, None]                          # [H, OUT]
    b_lin_f = t2 @ p["w_lin"] + p["lin_b"]                      # [OUT]

    slab = jnp.zeros((P_ROWS, LANES), jnp.float32)
    slab = slab.at[P_R_WGAT:P_R_WGAT + D, 0:H].set(w_gat_f)
    slab = slab.at[P_R_ATT:P_R_ATT + H, 0].set(p["att_dst"])
    slab = slab.at[P_R_ATT:P_R_ATT + H, 1].set(p["att_src"])
    slab = slab.at[P_R_WLIN:P_R_WLIN + H, 0:OUT].set(w_lin_f)
    slab = slab.at[P_R_BH, 0:H].set(b_h)
    slab = slab.at[P_R_GATB, 0:H].set(p["gat_b"])
    slab = slab.at[P_R_BLIN, 0:OUT].set(b_lin_f)
    return slab


def pack_inputs(x, adj, pool):
    """Pack BB graph-batches per grid step into one [272,128] slab (block-diag adj & pool)."""
    B = x.shape[0]
    assert B % BB == 0, "number of graph-batches must be a multiple of BB"
    S = B // BB

    x_blk = x.reshape(S, BBN, D)
    x_pad = jnp.zeros((S, BBN, LANES), jnp.float32).at[:, :, :D].set(x_blk)

    adj_blk = adj.reshape(S, BB, N, N)
    adj_bd = jnp.zeros((S, BBN, BBN), jnp.float32)
    for bb in range(BB):
        adj_bd = adj_bd.at[:, bb * N:(bb + 1) * N, bb * N:(bb + 1) * N].set(adj_blk[:, bb])

    pool_blk = pool.reshape(S, BB, G, N)
    pool_bd = jnp.zeros((S, BBG, BBN), jnp.float32)
    for bb in range(BB):
        pool_bd = pool_bd.at[:, bb * G:(bb + 1) * G, bb * N:(bb + 1) * N].set(pool_blk[:, bb])

    return jnp.concatenate([adj_bd, x_pad, pool_bd], axis=1)    # [S, 272, 128]


def reference_forward(x, adj, pool, p):
    """Pure-JAX eval-mode reference (unfolded BN, exact softmax) for correctness checking."""
    s1 = p["bn1_g"] / jnp.sqrt(p["bn1_rv"] + EPS)
    xb = (x - p["bn1_rm"]) * s1 + p["bn1_b"]
    h = jnp.einsum("bnd,dh->bnh", xb, p["w_gat"])
    a_dst = h @ p["att_dst"]
    a_src = h @ p["att_src"]
    e = a_dst[:, :, None] + a_src[:, None, :]
    e = jnp.where(e > 0, e, NEG_SLOPE * e)
    e = jnp.where(adj > 0, e, -jnp.inf)
    attn = jax.nn.softmax(e, axis=-1)
    msg = jnp.einsum("bij,bjh->bih", attn, h) + p["gat_b"]
    act = jnp.where(msg > 0, msg, jnp.expm1(jnp.minimum(msg, 0.0)))
    pooled = jnp.einsum("bgn,bnh->bgh", pool, act)
    s2 = p["bn2_g"] / jnp.sqrt(p["bn2_rv"] + EPS)
    z = (pooled - p["bn2_rm"]) * s2 + p["bn2_b"]
    return jnp.einsum("bgh,ho->bgo", z, p["w_lin"]) + p["lin_b"]


if __name__ == "__main__":
    B = 64  # graph-batches; packed BB=8 per step -> grid of 8 parallel steps
    key = jax.random.PRNGKey(0)
    keys = jax.random.split(key, 8)

    # Node features for B graph-batches.
    x = jax.random.normal(keys[0], (B, N, D), jnp.float32)

    # Batch vector: first half of nodes -> graph 0, second half -> graph 1.
    batch = jnp.repeat(jnp.arange(G, dtype=jnp.int32), N // G)

    # edge_index: bidirectional ring within each graph (same topology in every batch).
    src, dst = [], []
    n_g = N // G
    for g in range(G):
        base = g * n_g
        for i in range(n_g):
            j = (i + 1) % n_g
            src += [base + i, base + j]
            dst += [base + j, base + i]
    edge_index = jnp.array([src, dst], jnp.int32)                 # [2, E]

    # Dense adjacency adj[i, j] = 1 iff edge j -> i, plus self loops (GATConv default).
    adj1 = jnp.zeros((N, N), jnp.float32)
    adj1 = adj1.at[edge_index[1], edge_index[0]].set(1.0)
    adj1 = adj1.at[jnp.arange(N), jnp.arange(N)].set(1.0)
    adj = jnp.tile(adj1[None], (B, 1, 1))                         # [B, N, N]

    # Mean-pool matrix per graph-batch.
    onehot = (batch[None, :] == jnp.arange(G)[:, None]).astype(jnp.float32)
    pool1 = onehot / jnp.sum(onehot, axis=1, keepdims=True)       # [G, N]
    pool = jnp.tile(pool1[None], (B, 1, 1))                       # [B, G, N]

    # Deterministic parameter init (shapes follow the torch module; BN stats = torch defaults).
    params = dict(
        bn1_g=jnp.ones((D,), jnp.float32), bn1_b=jnp.zeros((D,), jnp.float32),
        bn1_rm=jnp.zeros((D,), jnp.float32), bn1_rv=jnp.ones((D,), jnp.float32),
        w_gat=0.3 * jax.random.normal(keys[1], (D, H), jnp.float32),
        att_src=0.3 * jax.random.normal(keys[2], (H,), jnp.float32),
        att_dst=0.3 * jax.random.normal(keys[3], (H,), jnp.float32),
        gat_b=jnp.zeros((H,), jnp.float32),
        bn2_g=jnp.ones((H,), jnp.float32), bn2_b=jnp.zeros((H,), jnp.float32),
        bn2_rm=jnp.zeros((H,), jnp.float32), bn2_rv=jnp.ones((H,), jnp.float32),
        w_lin=0.3 * jax.random.normal(keys[4], (H, OUT), jnp.float32),
        lin_b=jnp.zeros((OUT,), jnp.float32),
    )
    param_slab = pack_params(params)                              # [408, 128]
    in_slab = pack_inputs(x, adj, pool)                           # [8, 272, 128]

    out = gat_forward(in_slab, param_slab)                        # [B, G, OUT]
    jax.block_until_ready(out)

    ref = reference_forward(x, adj, pool, params)
    assert out.shape == (B, G, OUT)
    assert bool(jnp.all(jnp.isfinite(out)))
    max_err = float(jnp.max(jnp.abs(out - ref)))
    assert max_err < 5e-2, f"mismatch vs pure-JAX reference: {max_err}"
    print("KERNEL_OK")
</pallas_src>

<mosaic_0001>
module attributes {stable_mosaic.version = 11 : i64} {
  func.func @gat_block_kernel(%arg0: i32, %arg1: memref<1x272x128xf32, #tpu.memory_space<vmem>>, %arg2: memref<408x128xf32, #tpu.memory_space<vmem>>, %arg3: memref<16x128xf32, #tpu.memory_space<vmem>>) attributes {dimension_semantics = [#tpu.dimension_semantics<parallel>], iteration_bounds = array<i64: 8>, scalar_prefetch = 0 : i64, scratch_operands = 0 : i64, tpu.core_type = #tpu.core_type<tc>, window_params = [{transform_indices = @transform_0, window_bounds = array<i64: 1, 272, 128>}, {pipeline_mode = #tpu.pipeline_mode<synchronous>, transform_indices = @transform_1, window_bounds = array<i64: 408, 128>}, {transform_indices = @transform_2, window_bounds = array<i64: 16, 128>}]} {
    %c0 = arith.constant 0 : index
    %c0_0 = arith.constant 0 : index
    %c0_1 = arith.constant 0 : index
    %0 = vector.load %arg1[%c0, %c0_0, %c0_1] : memref<1x272x128xf32, #tpu.memory_space<vmem>>, vector<1x128x128xf32>
    %1 = vector.shape_cast %0 : vector<1x128x128xf32> to vector<128x128xf32>
    %c0_2 = arith.constant 0 : index
    %c128 = arith.constant 128 : index
    %c0_3 = arith.constant 0 : index
    %2 = vector.load %arg1[%c0_2, %c128, %c0_3] : memref<1x272x128xf32, #tpu.memory_space<vmem>>, vector<1x128x128xf32>
    %3 = vector.shape_cast %2 : vector<1x128x128xf32> to vector<128x128xf32>
    %c0_4 = arith.constant 0 : index
    %c256 = arith.constant 256 : index
    %c0_5 = arith.constant 0 : index
    %4 = vector.load %arg1[%c0_4, %c256, %c0_5] : memref<1x272x128xf32, #tpu.memory_space<vmem>>, vector<1x16x128xf32>
    %5 = vector.shape_cast %4 : vector<1x16x128xf32> to vector<16x128xf32>
    %c0_6 = arith.constant 0 : index
    %c0_7 = arith.constant 0 : index
    %6 = vector.load %arg2[%c0_6, %c0_7] : memref<408x128xf32, #tpu.memory_space<vmem>>, vector<128x128xf32>
    %c128_8 = arith.constant 128 : index
    %c0_9 = arith.constant 0 : index
    %7 = vector.load %arg2[%c128_8, %c0_9] : memref<408x128xf32, #tpu.memory_space<vmem>>, vector<128x128xf32>
    %c256_10 = arith.constant 256 : index
    %c0_11 = arith.constant 0 : index
    %8 = vector.load %arg2[%c256_10, %c0_11] : memref<408x128xf32, #tpu.memory_space<vmem>>, vector<128x128xf32>
    %c384 = arith.constant 384 : index
    %c0_12 = arith.constant 0 : index
    %9 = vector.load %arg2[%c384, %c0_12] : memref<408x128xf32, #tpu.memory_space<vmem>>, vector<1x128xf32>
    %c392 = arith.constant 392 : index
    %c0_13 = arith.constant 0 : index
    %10 = vector.load %arg2[%c392, %c0_13] : memref<408x128xf32, #tpu.memory_space<vmem>>, vector<1x128xf32>
    %c400 = arith.constant 400 : index
    %c0_14 = arith.constant 0 : index
    %11 = vector.load %arg2[%c400, %c0_14] : memref<408x128xf32, #tpu.memory_space<vmem>>, vector<1x128xf32>
    %cst = arith.constant dense<0.000000e+00> : vector<128x128xf32>
    %12 = tpu.matmul %3, %6, %cst {dimension_numbers = #tpu.dot_dimension_numbers<[1], [0], [0], [1], [0, 0, 1, 1], [], []>} : vector<128x128xf32>, vector<128x128xf32>, vector<128x128xf32> -> vector<128x128xf32>
    %13 = vector.broadcast %9 : vector<1x128xf32> to vector<128x128xf32>
    %14 = arith.addf %12, %13 : vector<128x128xf32>
    %cst_15 = arith.constant dense<0.000000e+00> : vector<128x128xf32>
    %15 = tpu.matmul %14, %7, %cst_15 {dimension_numbers = #tpu.dot_dimension_numbers<[1], [0], [0], [1], [0, 0, 1, 1], [], []>} : vector<128x128xf32>, vector<128x128xf32>, vector<128x128xf32> -> vector<128x128xf32>
    %16 = vector.extract_strided_slice %15 {offsets = [0, 0], sizes = [128, 1], strides = [1, 1]} : vector<128x128xf32> to vector<128x1xf32>
    %17 = tpu.transpose %15, [1, 0] : vector<128x128xf32> -> vector<128x128xf32>
    %18 = vector.extract_strided_slice %17 {offsets = [1, 0], sizes = [1, 128], strides = [1, 1]} : vector<128x128xf32> to vector<1x128xf32>
    %19 = vector.broadcast %16 : vector<128x1xf32> to vector<128x128xf32>
    %20 = vector.broadcast %18 : vector<1x128xf32> to vector<128x128xf32>
    %21 = arith.addf %19, %20 : vector<128x128xf32>
    %cst_16 = arith.constant 0.000000e+00 : f32
    %22 = vector.broadcast %cst_16 : f32 to vector<128x128xf32>
    %23 = arith.cmpf ogt, %21, %22 : vector<128x128xf32>
    %cst_17 = arith.constant 2.000000e-01 : f32
    %24 = vector.broadcast %cst_17 : f32 to vector<128x128xf32>
    %25 = arith.mulf %24, %21 : vector<128x128xf32>
    %26 = arith.select %23, %21, %25 : vector<128x128xi1>, vector<128x128xf32>
    %cst_18 = arith.constant 0.000000e+00 : f32
    %27 = vector.broadcast %cst_18 : f32 to vector<128x128xf32>
    %28 = arith.cmpf ogt, %1, %27 : vector<128x128xf32>
    %cst_19 = arith.constant -1.000000e+30 : f32
    %29 = vector.broadcast %cst_19 : f32 to vector<128x128xf32>
    %30 = arith.select %28, %26, %29 : vector<128x128xi1>, vector<128x128xf32>
    %cst_20 = arith.constant dense<0xFF800000> : vector<128xf32>
    %31 = vector.multi_reduction <maximumf>, %30, %cst_20 [1] : vector<128x128xf32> to vector<128xf32>
    %32 = vector.shape_cast %31 : vector<128xf32> to vector<128x1xf32>
    %33 = vector.broadcast %32 : vector<128x1xf32> to vector<128x128xf32>
    %34 = arith.subf %30, %33 : vector<128x128xf32>
    %35 = math.exp %34 : vector<128x128xf32>
    %cst_21 = arith.constant dense<0.000000e+00> : vector<128xf32>
    %36 = vector.multi_reduction <add>, %35, %cst_21 [1] : vector<128x128xf32> to vector<128xf32>
    %37 = vector.shape_cast %36 : vector<128xf32> to vector<128x1xf32>
    %38 = vector.broadcast %37 : vector<128x1xf32> to vector<128x128xf32>
    %39 = arith.divf %35, %38 : vector<128x128xf32>
    %40 = arith.truncf %39 : vector<128x128xf32> to vector<128x128xbf16>
    %41 = arith.truncf %14 : vector<128x128xf32> to vector<128x128xbf16>
    %cst_22 = arith.constant dense<0.000000e+00> : vector<128x128xf32>
    %42 = tpu.matmul %40, %41, %cst_22 {dimension_numbers = #tpu.dot_dimension_numbers<[1], [0], [0], [1], [0, 0, 1, 1], [], []>} : vector<128x128xbf16>, vector<128x128xbf16>, vector<128x128xf32> -> vector<128x128xf32>
    %43 = vector.broadcast %10 : vector<1x128xf32> to vector<128x128xf32>
    %44 = arith.addf %42, %43 : vector<128x128xf32>
    %cst_23 = arith.constant 0.000000e+00 : f32
    %45 = vector.broadcast %cst_23 : f32 to vector<128x128xf32>
    %46 = arith.cmpf ogt, %44, %45 : vector<128x128xf32>
    %cst_24 = arith.constant 0.000000e+00 : f32
    %47 = vector.broadcast %cst_24 : f32 to vector<128x128xf32>
    %48 = arith.minimumf %44, %47 : vector<128x128xf32>
    %49 = math.exp %48 : vector<128x128xf32>
    %cst_25 = arith.constant 1.000000e+00 : f32
    %50 = vector.broadcast %cst_25 : f32 to vector<128x128xf32>
    %51 = arith.subf %49, %50 : vector<128x128xf32>
    %52 = arith.select %46, %44, %51 : vector<128x128xi1>, vector<128x128xf32>
    %cst_26 = arith.constant dense<0.000000e+00> : vector<16x128xf32>
    %53 = tpu.matmul %5, %52, %cst_26 {dimension_numbers = #tpu.dot_dimension_numbers<[1], [0], [0], [1], [0, 0, 1, 1], [], []>} : vector<16x128xf32>, vector<128x128xf32>, vector<16x128xf32> -> vector<16x128xf32>
    %cst_27 = arith.constant dense<0.000000e+00> : vector<16x128xf32>
    %54 = tpu.matmul %53, %8, %cst_27 {dimension_numbers = #tpu.dot_dimension_numbers<[1], [0], [0], [1], [0, 0, 1, 1], [], []>} : vector<16x128xf32>, vector<128x128xf32>, vector<16x128xf32> -> vector<16x128xf32>
    %55 = vector.broadcast %11 : vector<1x128xf32> to vector<16x128xf32>
    %56 = arith.addf %54, %55 : vector<16x128xf32>
    %c0_28 = arith.constant 0 : index
    %c0_29 = arith.constant 0 : index
    %57 = vector.load %arg3[%c0_28, %c0_29] : memref<16x128xf32, #tpu.memory_space<vmem>>, vector<16x128xf32>
    tpu.vector_store %arg3[%c0_28, %c0_29], %56 {strides = array<i32>} : memref<16x128xf32, #tpu.memory_space<vmem>>, vector<16x128xf32>,
    return
  }
  func.func @transform_0(%arg0: i32) -> (i32, i32, i32) {
    %c0_i32 = arith.constant 0 : i32
    %c0_i32_0 = arith.constant 0 : i32
    %c0_i32_1 = arith.constant 0 : i32
    return %arg0, %c0_i32, %c0_i32_0 : i32, i32, i32
  }
  func.func @transform_1(%arg0: i32) -> (i32, i32) {
    %c0_i32 = arith.constant 0 : i32
    %c0_i32_0 = arith.constant 0 : i32
    %c0_i32_1 = arith.constant 0 : i32
    return %c0_i32, %c0_i32_0 : i32, i32
  }
  func.func @transform_2(%arg0: i32) -> (i32, i32) {
    %c0_i32 = arith.constant 0 : i32
    %c0_i32_0 = arith.constant 0 : i32
    return %arg0, %c0_i32 : i32, i32
  }
}

</mosaic_0001>

<bundles_post_ra>
// kernel: gat_forward.1
= control target key start
LH: loop header
LB: loop body
LE: loop exit
PB: predicated region body
PF: predicated region fallthrough
CT: control target
= control target key end

     0   :  { %7 = vsyncpa [#allocation3], 0  ;;  %s1979_s0 = inlined_call_operand.hbm [shape: f32[8,272,128], index: 0, kind: input, shape index: {}]   ;;  %s1980_s1 = inlined_call_operand.hbm [shape: f32[408,128], index: 1, kind: input, shape index: {}]   ;;  %s1981_s2 = inlined_call_operand.vmem [shape: f32[128,128], index: 2, kind: output, shape index: {}]  }
   0x1   :  { %9 = vsyncpa [#allocation3 + $0x1], 0 }
   0x2   :  { %10 = vsyncpa [#allocation5], 0  ;;  %s1554_s9 = smov 0   ;;  %s1556_s10 = smov 0  }
   0x3   :  { %s1558_s11 = smov 0   ;;  %s1560_s12 = smov 0  }
   0x4 LB: > { %s1249_s13 = sadd.s32 4294967295, %s1533_s12   ;;  %p36_p0 = scmp.ne.s32.totalorder %s1525_s10, %s1521_s9  ;;  %s1533_s12 = sphi %s1560_s12, %s1989_s12   ;;  %s1529_s11 = sphi %s1558_s11, %s1988_s11   ;;  %s1525_s10 = sphi %s1556_s10, %s1987_s10   ;;  %s1521_s9 = sphi %s1554_s9, %s1986_s9  }
   0x5   : > { %p1576_p1 = scmp.eq.s32.totalorder %s1249_s13, 0  ;;  %p1251_p2 = scmp.ge.s32.totalorder %s1533_s12, 1 }
   0x6   : > { %p94_p3 = scmp.lt.s32.totalorder %s1533_s12, 9  ;;  %s105_s18 = sshll.u32 %s1980_s1, 4  ;;  %s106_s18 = int_to_ptr.hbm [resolvable:$true] %s105_s18 }
   0x7   : > { %p1584_p4 = por %p1576_p1, %p36_p0  ;;  %s1535_s20 = smov [#allocation4]  }
   0x8   : > { %p1591_p5 = pnand %p1251_p2, %p94_p3  ;;  %s107_s21 = sshll.u32 %s1535_s20, 4  ;;  %s108_s21 = int_to_ptr.vmem [resolvable:$true] %s107_s21 }
   0x9   : > { %s1600_s22 = sadd.s32 1, %s1533_s12   ;;  %s1536_s23 = smov 128  }
   0xa   : > { %p1286_p6 = pneg %p1591_p5  ;;  %s1537_s24 = smov 8  }
   0xb   : > { %s20_s25 = ssub.s32 %s1533_s12, %s1600_s22  ;;  %s23_s26 = sadd.s32 1, %s1529_s11 }
   0xc   : > { %p1287_p7 = pnand %p1286_p6, %p1576_p1  ;;  %p21_p8 = scmp.eq.s32.totalorder %s20_s25, 0 }
   0xd   : > { %p30_p9 = scmp.ne.s32.totalorder %s1529_s11, %s1525_s10  ;;  %p31_p10 = scmp.eq.s32.totalorder %s1533_s12, 0 }
   0xe   : > { %1289 = dma.hbm_to_vmem [thread:$0]  (!%p1287_p7), %s106_s18, 6528, %s108_s21, [#allocation5], %s1536_s23, %s1536_s23, %s1537_s24  }
   0xf   : > { %p1295_p11 = scmp.lt.s32.totalorder %s1533_s12, 8  ;;  %p32_p12 = por %p31_p10, %p30_p9 }
  0x10   : > { %s1613_s27 = scalar_select %p21_p8, %s1529_s11, %s23_s26  }
  0x11   : > { %s121_s28 = sand.u32 1, %s1529_s11   ;;  %s1278_s30 = smul.u32 272, %s1533_s12 }
  0x12   : > { %s1277_s29 = smul.u32 272, %s121_s28  ;;  %p1617_p13 = pnand %p1295_p11, %p32_p12 }
  0x13   : > { %s130_s6 = scalar_lea.hbm %s1979_s0, %s1278_s30  ;;  %s122_s16 = scalar_lea.sflag [#allocation3], %s121_s28 }
  0x14   : > { %s125_s7 = scalar_lea.vmem [#allocation2], %s1277_s29  ;;  %s131_s9 = sshll.u32 %s130_s6, 4  ;;  %s132_s9 = int_to_ptr.hbm [resolvable:$true] %s131_s9 }
  0x15   : > { %s133_s8 = sshll.u32 %s125_s7, 4  ;;  %s1465_s17 = sshra.s32 %s132_s9, 4  ;;  %s134_s8 = int_to_ptr.vmem [resolvable:$true] %s133_s8  ;;  %s1466_s17 = int_to_ptr.hbm [resolvable:$true] %s1465_s17 }
  0x16   : > { %s1467_s18 = scalar_lea.hbm %s1466_s17, 272  ;;  %p1469_p2 = pneg %p1617_p13 }
  0x17   : > { %p1468_p0 = scmp.ne.s32.totalorder %s1466_s17, %s1467_s18  ;;  %s1472_s25 = scalar_lea.hbm %s1979_s0, 2176 }
  0x18   : > { %p1473_p7 = scmp.lt.s32.totalorder %s1466_s17, %s1979_s0  ;;  %p1474_p8 = scmp.lt.s32.totalorder %s1472_s25, %s1467_s18 }
  0x19   : > { %p1470_p3 = pnand %p1469_p2, %p1468_p0 }
  0x1a   : > { %p1475_p9 = por %p1474_p8, %p1473_p7 }
  0x1b   : > { %p1471_p6 = pneg %p1470_p3 }
  0x1d   : > { %p1476_p10 = pnand %p1475_p9, %p1471_p6 }
  0x1f   : > { %1479 = shalt.err (!%p1476_p10)
}
  0x20   : > { %1293 = dma.hbm_to_vmem [thread:$0]  (!%p1617_p13), %s132_s9, 4352, %s134_s8, %s122_s16, %s1536_s23, %s1536_s23, %s1537_s24  }
  0x21   : > { %145 = sbr.rel (%p1591_p5) target bundleno = 1594 (0x63a), region = 28  ;;  %s147_s28 = sand.u32 (!%p1591_p5), 1, %s1525_s10  }
  0x22   : > { %s1279_s29 = smul.u32 (!%p1591_p5), 272, %s147_s28  ;;  %s148_s4 = scalar_lea.sflag (!%p1591_p5), [#allocation3], %s147_s28 }
  0x24   : > { %s1640_s5 = scalar_lea.vmem (!%p1591_p5), [#allocation2], %s1279_s29 }
  0x26   : > { %1512 = dma.done.wait (%p1584_p4), %s148_s4, 4352  }
  0x27   : > { %1514 = vsyncadd (%p1584_p4), %s148_s4, 4294962944 }
  0x28   : > { %1516 = dma.done.wait (%p1576_p1), [#allocation5], 6528  }
  0x29   : > { %1518 = vsyncadd (%p1576_p1), [#allocation5], 4294960768  ;;  %v233_v0 = vld [vmem:[#allocation4 + $0x78] sm:$0xff]  ;;  %v232_v1 = vld [vmem:[#allocation4 + $0x70] sm:$0xff]  ;;  %s1257_s14 = sshll.u32 %s1249_s13, 1 }
  0x2a   : > { %270 = vmatpush.msra.mxu0 %v233_v0  ;;  %v231_v2 = vld [vmem:[#allocation4 + $0x68] sm:$0xff]  ;;  %v230_v3 = vld [vmem:[#allocation4 + $0x60] sm:$0xff]  ;;  %v229_v4 = vld [vmem:[#allocation4 + $0x58] sm:$0xff]  ;;  %p179_p1 = scmp.lt.s32.totalorder %s1257_s14, 15 }
  0x2b   : > { %v228_v5 = vld [vmem:[#allocation4 + $0x50] sm:$0xff]  ;;  %v227_v6 = vld [vmem:[#allocation4 + $0x48] sm:$0xff]  ;;  %v226_v7 = vld [vmem:[#allocation4 + $0x40] sm:$0xff] }
  0x2c   : > { %271 = vmatpush.msra.mxu0 %v232_v1  ;;  %v225_v8 = vld [vmem:[#allocation4 + $0x38] sm:$0xff]  ;;  %v224_v9 = vld [vmem:[#allocation4 + $0x30] sm:$0xff]  ;;  %v223_v10 = vld [vmem:[#allocation4 + $0x28] sm:$0xff]  ;;  %s1991_s14 = smov (!%p179_p1, %s1257_s14), 15 }
  0x2d   : > { %v222_v11 = vld [vmem:[#allocation4 + $0x20] sm:$0xff]  ;;  %v221_v12 = vld [vmem:[#allocation4 + $0x18] sm:$0xff]  ;;  %v220_v13 = vld [vmem:[#allocation4 + $0x10] sm:$0xff]  ;;  %s1258_s15 = sshll.u32 %s1991_s14, 3 }
  0x2e   : > { %272 = vmatpush.msra.mxu0 %v231_v2  ;;  %v219_v14 = vld [vmem:[#allocation4 + $0x8] sm:$0xff]  ;;  %v218_v15 = vld [vmem:[#allocation4] sm:$0xff]  ;;  %v249_v25 = vld [vmem:[#allocation4 + $0xf8] sm:$0xff]  ;;  %s182_s24 = scalar_lea.vmem %s1981_s2, %s1258_s15 }
  0x2f   : > { %v200_v16 = vld [vmem:[%s1640_s5 + $0x80] sm:$0xff]  ;;  %v201_v17 = vld [vmem:[%s1640_s5 + $0x88] sm:$0xff]  ;;  %v202_v18 = vld [vmem:[%s1640_s5 + $0x90] sm:$0xff]  ;;  %335 = vmatpush.msra.mxu1 %v249_v25 }
  0x30   : > { %273 = vmatpush.msra.mxu0 %v230_v3  ;;  %v203_v19 = vld [vmem:[%s1640_s5 + $0x98] sm:$0xff]  ;;  %v204_v20 = vld [vmem:[%s1640_s5 + $0xa0] sm:$0xff]  ;;  %v205_v21 = vld [vmem:[%s1640_s5 + $0xa8] sm:$0xff] }
  0x31   : > { %v206_v22 = vld [vmem:[%s1640_s5 + $0xb0] sm:$0xff]  ;;  %v207_v23 = vld [vmem:[%s1640_s5 + $0xb8] sm:$0xff]  ;;  %v208_v24 = vld [vmem:[%s1640_s5 + $0xc0] sm:$0xff] }
  0x32   : > { %274 = vmatpush.msra.mxu0 %v229_v4  ;;  %v248_v26 = vld [vmem:[#allocation4 + $0xf0] sm:$0xff]  ;;  %v247_v27 = vld [vmem:[#allocation4 + $0xe8] sm:$0xff]  ;;  %v246_v28 = vld [vmem:[#allocation4 + $0xe0] sm:$0xff] }
  0x33   : > { %336 = vmatpush.msra.mxu1 %v248_v26  ;;  %v209_v29 = vld [vmem:[%s1640_s5 + $0xc8] sm:$0xff]  ;;  %v244_v31 = vld [vmem:[#allocation4 + $0xd0] sm:$0xff]  ;;  %v242_v33 = vld [vmem:[#allocation4 + $0xc0] sm:$0xff] }
  0x34   : > { %275 = vmatpush.msra.mxu0 %v228_v5  ;;  %v245_v30 = vld [vmem:[#allocation4 + $0xd8] sm:$0xff]  ;;  %v243_v32 = vld [vmem:[#allocation4 + $0xc8] sm:$0xff]  ;;  %v210_v34 = vld [vmem:[%s1640_s5 + $0xd0] sm:$0xff] }
  0x35   : > { %337 = vmatpush.msra.mxu1 %v247_v27  ;;  %v241_v35 = vld [vmem:[#allocation4 + $0xb8] sm:$0xff]  ;;  %v240_v36 = vld [vmem:[#allocation4 + $0xb0] sm:$0xff]  ;;  %v239_v37 = vld [vmem:[#allocation4 + $0xa8] sm:$0xff] }
  0x36   : > { %276 = vmatpush.msra.mxu0 %v227_v6  ;;  %v238_v38 = vld [vmem:[#allocation4 + $0xa0] sm:$0xff]  ;;  %v211_v39 = vld [vmem:[%s1640_s5 + $0xd8] sm:$0xff]  ;;  %v236_v41 = vld [vmem:[#allocation4 + $0x90] sm:$0xff] }
  0x37   : > { %338 = vmatpush.msra.mxu1 %v246_v28  ;;  %v237_v40 = vld [vmem:[#allocation4 + $0x98] sm:$0xff]  ;;  %v235_v42 = vld [vmem:[#allocation4 + $0x88] sm:$0xff]  ;;  %v212_v43 = vld [vmem:[%s1640_s5 + $0xe0] sm:$0xff] }
  0x38   : > { %277 = vmatpush.msra.mxu0 %v226_v7  ;;  %v234_v44 = vld [vmem:[#allocation4 + $0x80] sm:$0xff]  ;;  %v213_v45 = vld [vmem:[%s1640_s5 + $0xe8] sm:$0xff]  ;;  %v215_v47 = vld [vmem:[%s1640_s5 + $0xf8] sm:$0xff] }
  0x39   : > { %339 = vmatpush.msra.mxu1 %v245_v30  ;;  %v214_v46 = vld [vmem:[%s1640_s5 + $0xf0] sm:$0xff] }
  0x3a   : > { %278 = vmatpush.msra.mxu0 %v225_v8  ;;  %v1336_v48 = vld [vmem:[#allocation4 + $0x180] ss:$0 sm:$0xff] }
  0x3b   : > { %340 = vmatpush.msra.mxu1 %v244_v31 }
  0x3c   : > { %279 = vmatpush.msra.mxu0 %v224_v9 }
  0x3d   : > { %341 = vmatpush.msra.mxu1 %v243_v32 }
  0x3e   : > { %280 = vmatpush.msra.mxu0 %v223_v10 }
  0x3f   : > { %342 = vmatpush.msra.mxu1 %v242_v33 }
  0x40   : > { %281 = vmatpush.msra.mxu0 %v222_v11 }
  0x41   : > { %343 = vmatpush.msra.mxu1 %v241_v35 }
  0x42   : > { %282 = vmatpush.msra.mxu0 %v221_v12 }
  0x43   : > { %344 = vmatpush.msra.mxu1 %v240_v36 }
  0x44   : > { %283 = vmatpush.msra.mxu0 %v220_v13  ;;  %v1538_v13 = vmov 0  }
  0x45   : > { %345 = vmatpush.msra.mxu1 %v239_v37  ;;  %1333 = vset.pattern.permute.xlu0 %v1538_v13 }
  0x46   : > { %284 = vmatpush.msra.mxu0 %v219_v14  ;;  %1334 = vset.pattern.permute.xlu1 %v1538_v13 }
  0x47   : > { %346 = vmatpush.msra.mxu1 %v238_v38  ;;  %1335 = vset.pattern.permute.xlu2 %v1538_v13 }
  0x48   : > { %285 = vmatpush.msra.mxu0 %v218_v15 }
  0x49   : > { %286 = vmatmul.f32.vlgmr.msra.gmra.mxu0 %v200_v16  ;;  %347 = vmatpush.msra.mxu1 %v237_v40 }
  0x4b   : > { %348 = vmatpush.msra.mxu1 %v236_v41 }
  0x4d   : > { %349 = vmatpush.msra.mxu1 %v235_v42 }
  0x4f   : > { %350 = vmatpush.msra.mxu1 %v234_v44 }
  0x51   : > { %289 = vmatmul.f32.gmra.mxu0 %v201_v17 }
  0x59   : > { %292 = vmatmul.f32.gmra.mxu0 %v202_v18 }
  0x61   : > { %295 = vmatmul.f32.gmra.mxu0 %v203_v19 }
  0x69   : > { %298 = vmatmul.f32.gmra.mxu0 %v204_v20 }
  0x71   : > { %301 = vmatmul.f32.gmra.mxu0 %v205_v21 }
  0x79   : > { %304 = vmatmul.f32.gmra.mxu0 %v206_v22 }
  0x81   : > { %307 = vmatmul.f32.gmra.mxu0 %v207_v23 }
  0x89   : > { %310 = vmatmul.f32.gmra.mxu0 %v208_v24 }
  0x91   : > { %313 = vmatmul.f32.gmra.mxu0 %v209_v29 }
  0x99   : > { %316 = vmatmul.f32.gmra.mxu0 %v210_v34 }
  0xa1   : > { %319 = vmatmul.f32.gmra.mxu0 %v211_v39 }
  0xa9   : > { %322 = vmatmul.f32.gmra.mxu0 %v212_v43 }
  0xb1   : > { %325 = vmatmul.f32.gmra.mxu0 %v213_v45 }
  0xb9   : > { %328 = vmatmul.f32.gmra.mxu0 %v214_v46 }
  0xc1   : > { %331 = vmatmul.f32.gmra.mxu0 %v215_v47  ;;  %v185_v47 = vld [vmem:[%s1640_s5 + $0x8] sm:$0xff] }
  0xc2   : > { %vm578_vm1 = vcmp.gt.f32.partialorder %v185_v47, 0.0 }
  0xc6   : > { %v287_v49 = vpop.f32.mrf.mxu0 }
  0xc7   : > { %v1666_v50 = vadd.f32 %v1336_v48, %v287_v49  ;;  %v184_v49 = vld [vmem:[%s1640_s5] sm:$0xff] }
  0xc8   : > { %vm577_vm3 = vcmp.gt.f32.partialorder %v184_v49, 0.0 }
  0xc9   : > { %351 = vmatmul.f32.vlgmr.msra.gmra.mxu1 %v1666_v50 }
  0xce   : > { %v290_v51 = vpop.f32.mrf.mxu0 }
  0xcf   : > { %v1669_v52 = vadd.f32 %v1336_v48, %v290_v51 }
  0xd1   : > { %354 = vmatmul.f32.gmra.mxu1 %v1669_v52  ;;  %v969_v53 = vpack.c.bf16 %v1669_v52, %v1666_v50 }
  0xd6   : > { %v293_v54 = vpop.f32.mrf.mxu0 }
  0xd7   : > { %v1674_v55 = vadd.f32 %v1336_v48, %v293_v54 }
  0xd9   : > { %357 = vmatmul.f32.gmra.mxu1 %v1674_v55 }
  0xde   : > { %v296_v56 = vpop.f32.mrf.mxu0 }
  0xdf   : > { %v297_v57 = vadd.f32 %v1336_v48, %v296_v56 }
  0xe1   : > { %360 = vmatmul.f32.gmra.mxu1 %v297_v57  ;;  %v970_v58 = vpack.c.bf16 %v297_v57, %v1674_v55 }
  0xe6   : > { %v299_v59 = vpop.f32.mrf.mxu0 }
  0xe7   : > { %v300_v60 = vadd.f32 %v1336_v48, %v299_v59 }
  0xe9   : > { %363 = vmatmul.f32.gmra.mxu1 %v300_v60 }
  0xee   : > { %v302_v61 = vpop.f32.mrf.mxu0 }
  0xef   : > { %v303_v62 = vadd.f32 %v1336_v48, %v302_v61  ;;  %v186_v61 = vld [vmem:[%s1640_s5 + $0x10] sm:$0xff] }
  0xf0   : > { %vm579_vm5 = vcmp.gt.f32.partialorder %v186_v61, 0.0 }
  0xf1   : > { %366 = vmatmul.f32.gmra.mxu1 %v303_v62  ;;  %v971_v63 = vpack.c.bf16 %v303_v62, %v300_v60 }
  0xf6   : > { %v305_v0 = vpop.f32.mrf.mxu0 }
  0xf7   : > { %v306_v1 = vadd.f32 %v1336_v48, %v305_v0 }
  0xf9   : > { %369 = vmatmul.f32.gmra.mxu1 %v306_v1 }
  0xfe   : > { %v308_v2 = vpop.f32.mrf.mxu0 }
  0xff   : > { %v309_v3 = vadd.f32 %v1336_v48, %v308_v2 }
 0x101   : > { %372 = vmatmul.f32.gmra.mxu1 %v309_v3  ;;  %v972_v4 = vpack.c.bf16 %v309_v3, %v306_v1  ;;  %v190_v3 = vld [vmem:[%s1640_s5 + $0x30] sm:$0xff] }
 0x102   : > { %vm583_vm7 = vcmp.gt.f32.partialorder %v190_v3, 0.0 }
 0x106   : > { %v311_v5 = vpop.f32.mrf.mxu0 }
 0x107   : > { %v312_v6 = vadd.f32 %v1336_v48, %v311_v5 }
 0x109   : > { %375 = vmatmul.f32.gmra.mxu1 %v312_v6 }
 0x10e   : > { %v314_v7 = vpop.f32.mrf.mxu0 }
 0x10f   : > { %v315_v8 = vadd.f32 %v1336_v48, %v314_v7 }
 0x111   : > { %378 = vmatmul.f32.gmra.mxu1 %v315_v8  ;;  %v973_v26 = vpack.c.bf16 %v315_v8, %v312_v6  ;;  %v193_v8 = vld [vmem:[%s1640_s5 + $0x48] sm:$0xff] }
 0x112   : > { %vm586_vm9 = vcmp.gt.f32.partialorder %v193_v8, 0.0 }
 0x116   : > { %v317_v9 = vpop.f32.mrf.mxu0 }
 0x117   : > { %v318_v10 = vadd.f32 %v1336_v48, %v317_v9 }
 0x119   : > { %381 = vmatmul.f32.gmra.mxu1 %v318_v10 }
 0x11e   : > { %v320_v11 = vpop.f32.mrf.mxu0 }
 0x11f   : > { %v321_v12 = vadd.f32 %v1336_v48, %v320_v11 }
 0x121   : > { %384 = vmatmul.f32.gmra.mxu1 %v321_v12  ;;  %v974_v25 = vpack.c.bf16 %v321_v12, %v318_v10 }
 0x126   : > { %v323_v14 = vpop.f32.mrf.mxu0 }
 0x127   : > { %v324_v15 = vadd.f32 %v1336_v48, %v323_v14  ;;  %v187_v14 = vld [vmem:[%s1640_s5 + $0x18] sm:$0xff] }
 0x128   : > { %vm580_vm11 = vcmp.gt.f32.partialorder %v187_v14, 0.0 }
 0x129   : > { %387 = vmatmul.f32.gmra.mxu1 %v324_v15 }
 0x12e   : > { %v326_v16 = vpop.f32.mrf.mxu0 }
 0x12f   : > { %v327_v17 = vadd.f32 %v1336_v48, %v326_v16 }
 0x131   : > { %390 = vmatmul.f32.gmra.mxu1 %v327_v17  ;;  %v975_v23 = vpack.c.bf16 %v327_v17, %v324_v15 }
 0x136   : > { %v329_v18 = vpop.f32.mrf.mxu0 }
 0x137   : > { %v330_v19 = vadd.f32 %v1336_v48, %v329_v18 }
 0x139   : > { %393 = vmatmul.f32.gmra.mxu1 %v330_v19 }
 0x13e   : > { %v332_v20 = vpop.f32.mrf.mxu0 }
 0x13f   : > { %v333_v21 = vadd.f32 %v1336_v48, %v332_v20 }
 0x141   : > { %v976_v22 = vpack.c.bf16 %v333_v21, %v330_v19  ;;  %396 = vmatmul.f32.gmra.mxu1 %v333_v21  ;;  %v188_v19 = vld [vmem:[%s1640_s5 + $0x20] sm:$0xff] }
 0x142   : > { %vm581_vm13 = vcmp.gt.f32.partialorder %v188_v19, 0.0 }
 0x143   : > { %978 = vmatpush.bf16.msra.mxu2 %v976_v22 }
 0x146   : > { %v352_v24 = vpop.f32.mrf.mxu1 }
 0x147   : > { %979 = vmatpush.bf16.msra.mxu2 %v975_v23  ;;  %434 = vperm.xlu0 %1333, %v352_v24  }
 0x14b   : > { %980 = vmatpush.bf16.msra.mxu2 %v974_v25  ;;  %v189_v25 = vld [vmem:[%s1640_s5 + $0x28] sm:$0xff] }
 0x14c   : > { %vm582_vm15 = vcmp.gt.f32.partialorder %v189_v25, 0.0 }
 0x14e   : > { %v355_v27 = vpop.f32.mrf.mxu1 }
 0x14f   : > { %981 = vmatpush.bf16.msra.mxu2 %v973_v26  ;;  %439 = vperm.xlu0 %1333, %v355_v27  }
 0x153   : > { %982 = vmatpush.bf16.msra.mxu2 %v972_v4 }
 0x156   : > { %v358_v28 = vpop.f32.mrf.mxu1 }
 0x157   : > { %983 = vmatpush.bf16.msra.mxu2 %v971_v63  ;;  %444 = vperm.xlu1 %1334, %v358_v28  }
 0x15b   : > { %984 = vmatpush.bf16.msra.mxu2 %v970_v58 }
 0x15e   : > { %v361_v29 = vpop.f32.mrf.mxu1 }
 0x15f   : > { %985 = vmatpush.bf16.msra.mxu2 %v969_v53  ;;  %449 = vperm.xlu1 %1334, %v361_v29  }
 0x166   : > { %v364_v30 = vpop.f32.mrf.mxu1 }
 0x167   : > { %454 = vperm.xlu0 %1333, %v364_v30  }
 0x16e   : > { %v367_v31 = vpop.f32.mrf.mxu1 }
 0x16f   : > { %459 = vperm.xlu1 %1334, %v367_v31  }
 0x176   : > { %v370_v32 = vpop.f32.mrf.mxu1 }
 0x177   : > { %464 = vperm.xlu0 %1333, %v370_v32  }
 0x17e   : > { %v373_v33 = vpop.f32.mrf.mxu1 }
 0x17f   : > { %469 = vperm.xlu1 %1334, %v373_v33  }
 0x186   : > { %v376_v34 = vpop.f32.mrf.mxu1 }
 0x187   : > { %474 = vperm.xlu0 %1333, %v376_v34  }
 0x18e   : > { %v379_v35 = vpop.f32.mrf.mxu1 }
 0x18f   : > { %479 = vperm.xlu2 %1335, %v379_v35  }
 0x196   : > { %v382_v36 = vpop.f32.mrf.mxu1 }
 0x197   : > { %484 = vperm.xlu0 %1333, %v382_v36  }
 0x19e   : > { %v385_v37 = vpop.f32.mrf.mxu1 }
 0x19f   : > { %489 = vperm.xlu1 %1334, %v385_v37  }
 0x1a6   : > { %v388_v38 = vpop.f32.mrf.mxu1 }
 0x1a7   : > { %494 = vperm.xlu0 %1333, %v388_v38  }
 0x1ae   : > { %v391_v39 = vpop.f32.mrf.mxu1 }
 0x1b5   : > { %400 = vxpose.xlu2.b32.start [1/16] (narrow) %v352_v24, 8 }
 0x1b6   : > { %v1681_v40 = vpop.f32.mrf.mxu1 }
 0x1b9   : > { %v435_v42 = vpop.permute.xlu0 %434 }
 0x1bd   : > { %401 = vxpose.xlu2.b32.cont [2/16] (narrow) %v355_v27, 8 }
 0x1be   : > { %v1684_v41 = vpop.f32.mrf.mxu1 }
 0x1c1   : > { %v440_v44 = vpop.permute.xlu0 %439 }
 0x1c5   : > { %402 = vxpose.xlu2.b32.cont [3/16] (narrow) %v358_v28, 8 }
 0x1c9   : > { %v445_v51 = vpop.permute.xlu1 %444 }
 0x1cd   : > { %403 = vxpose.xlu2.b32.cont [4/16] (narrow) %v361_v29, 8 }
 0x1d1   : > { %v450_v11 = vpop.permute.xlu1 %449 }
 0x1d5   : > { %404 = vxpose.xlu2.b32.cont [5/16] (narrow) %v364_v30, 8 }
 0x1d9   : > { %v455_v52 = vpop.permute.xlu0 %454 }
 0x1dd   : > { %405 = vxpose.xlu2.b32.cont [6/16] (narrow) %v367_v31, 8  ;;  %v191_v31 = vld [vmem:[%s1640_s5 + $0x38] sm:$0xff] }
 0x1e1   : > { %v460_v20 = vpop.permute.xlu1 %459 }
 0x1e5   : > { %406 = vxpose.xlu2.b32.cont [7/16] (narrow) %v370_v32, 8 }
 0x1e9   : > { %v480_v43 = vpop.permute.xlu2 %479  ;;  %v465_v62 = vpop.permute.xlu0 %464 }
 0x1ed   : > { %407 = vxpose.xlu2.b32.cont [8/16] (narrow) %v373_v33, 8 }
 0x1f1   : > { %v470_v26 = vpop.permute.xlu1 %469 }
 0x1f5   : > { %408 = vxpose.xlu2.b32.cont [9/16] (narrow) %v376_v34, 8 }
 0x1f9   : > { %v475_v32 = vpop.permute.xlu0 %474 }
 0x1fd   : > { %409 = vxpose.xlu2.b32.cont [10/16] (narrow) %v379_v35, 8 }
 0x205   : > { %410 = vxpose.xlu2.b32.cont [11/16] (narrow) %v382_v36, 8 }
 0x20d   : > { %411 = vxpose.xlu2.b32.cont [12/16] (narrow) %v385_v37, 8  ;;  %v192_v37 = vld [vmem:[%s1640_s5 + $0x40] sm:$0xff] }
 0x215   : > { %412 = vxpose.xlu2.b32.cont [13/16] (narrow) %v388_v38, 8 }
 0x21d   : > { %413 = vxpose.xlu2.b32.cont [14/16] (narrow) %v391_v39, 8 }
 0x225   : > { %414 = vxpose.xlu2.b32.cont [15/16] (narrow) %v1681_v40, 8 }
 0x22d   : > { %415 = vxpose.xlu2.b32.end [16/16] (narrow) %v1684_v41, 8 }
 0x24e   : > { %v416_v45 = vpop.trf.xlu2 }
 0x24f   : > { %v1687_v46 = vperm.slane %v416_v45, 1 }
 0x251   : > { %v514_v48 = vadd.f32 %v1687_v46, %v440_v44  ;;  %v513_v50 = vadd.f32 %v1687_v46, %v435_v42  ;;  %v515_v55 = vadd.f32 %v1687_v46, %v445_v51  ;;  %v519_v0 = vadd.f32 %v1687_v46, %v465_v62 }
 0x252   : > { %v522_v5 = vadd.f32 %v1687_v46, %v480_v43  ;;  %v516_v12 = vadd.f32 %v1687_v46, %v450_v11  ;;  %v517_v16 = vadd.f32 %v1687_v46, %v455_v52  ;;  %v518_v22 = vadd.f32 %v1687_v46, %v460_v20  ;;  %v490_v43 = vpop.permute.xlu1 %489 }
 0x253   : > { %vm530_vm0 = vcmp.gt.f32.partialorder %v514_v48, 0.0  ;;  %vm529_vm2 = vcmp.gt.f32.partialorder %v513_v50, 0.0  ;;  %v546_v53 = vmul.f32 0.2, %v514_v48  ;;  %v545_v54 = vmul.f32 0.2, %v513_v50 }
 0x254   : > { %v547_v60 = vmul.f32 0.2, %v515_v55  ;;  %vm531_vm4 = vcmp.gt.f32.partialorder %v515_v55, 0.0  ;;  %v551_v2 = vmul.f32 0.2, %v519_v0  ;;  %vm535_vm6 = vcmp.gt.f32.partialorder %v519_v0, 0.0 }
 0x255   : > { %v562_v56 = vsel %vm530_vm0, %v514_v48, %v546_v53  ;;  %v561_v57 = vsel %vm529_vm2, %v513_v50, %v545_v54  ;;  %v554_v7 = vmul.f32 0.2, %v522_v5  ;;  %vm538_vm8 = vcmp.gt.f32.partialorder %v522_v5, 0.0 }
 0x256   : > { %v1694_v58 = vsel %vm578_vm1, %v562_v56, -1e+30  ;;  %v1696_v59 = vsel %vm577_vm3, %v561_v57, -1e+30  ;;  %v563_v63 = vsel %vm531_vm4, %v515_v55, %v547_v60  ;;  %v567_v4 = vsel %vm535_vm6, %v519_v0, %v551_v2  ;;  %v194_v60 = vld [vmem:[%s1640_s5 + $0x50] sm:$0xff] }
 0x257   : > { %611 = vmax.xlane.f32.xlu1 %v1694_v58  ;;  %609 = vmax.xlane.f32.xlu0 %v1696_v59  ;;  %v1702_v1 = vsel %vm579_vm5, %v563_v63, -1e+30  ;;  %v1707_v6 = vsel %vm583_vm7, %v567_v4, -1e+30  ;;  %v570_v9 = vsel %vm538_vm8, %v522_v5, %v554_v7  ;;  %v548_v13 = vmul.f32 0.2, %v516_v12 }
 0x258   : > { %v1711_v10 = vsel %vm586_vm9, %v570_v9, -1e+30  ;;  %vm532_vm10 = vcmp.gt.f32.partialorder %v516_v12, 0.0  ;;  %v549_v18 = vmul.f32 0.2, %v517_v16  ;;  %vm533_vm12 = vcmp.gt.f32.partialorder %v517_v16, 0.0 }
 0x259   : > { %v564_v15 = vsel %vm532_vm10, %v516_v12, %v548_v13  ;;  %v550_v24 = vmul.f32 0.2, %v518_v22  ;;  %vm534_vm14 = vcmp.gt.f32.partialorder %v518_v22, 0.0  ;;  %v520_v28 = vadd.f32 %v1687_v46, %v470_v26  ;;  %v195_v13 = vld [vmem:[%s1640_s5 + $0x58] sm:$0xff] }
 0x25a   : > { %v1717_v17 = vsel %vm580_vm11, %v564_v15, -1e+30  ;;  %v565_v21 = vsel %vm533_vm12, %v517_v16, %v549_v18  ;;  %vm584_vm1 = vcmp.gt.f32.partialorder %v191_v31, 0.0  ;;  %v521_v34 = vadd.f32 %v1687_v46, %v475_v32 }
 0x25b   : > { %v1722_v23 = vsel %vm581_vm13, %v565_v21, -1e+30  ;;  %v566_v27 = vsel %vm534_vm14, %v518_v22, %v550_v24  ;;  %v552_v30 = vmul.f32 0.2, %v520_v28  ;;  %vm536_vm0 = vcmp.gt.f32.partialorder %v520_v28, 0.0 }
 0x25c   : > { %v1727_v29 = vsel %vm582_vm15, %v566_v27, -1e+30  ;;  %v553_v36 = vmul.f32 0.2, %v521_v34  ;;  %vm537_vm2 = vcmp.gt.f32.partialorder %v521_v34, 0.0  ;;  %vm585_vm3 = vcmp.gt.f32.partialorder %v192_v37, 0.0 }
 0x25d   : > { %v568_v33 = vsel %vm536_vm0, %v520_v28, %v552_v30  ;;  %vm587_vm5 = vcmp.gt.f32.partialorder %v194_v60, 0.0  ;;  %v524_v5 = vadd.f32 %v1687_v46, %v490_v43  ;;  %vm588_vm9 = vcmp.gt.f32.partialorder %v195_v13, 0.0 }
 0x25e   : > { %v1732_v35 = vsel %vm584_vm1, %v568_v33, -1e+30  ;;  %v569_v38 = vsel %vm537_vm2, %v521_v34, %v553_v36 }
 0x25f   : > { %613 = vmax.xlane.f32.xlu0 %v1702_v1  ;;  %v1736_v42 = vsel %vm585_vm3, %v569_v38, -1e+30  ;;  %v556_v11 = vmul.f32 0.2, %v524_v5  ;;  %vm540_vm8 = vcmp.gt.f32.partialorder %v524_v5, 0.0 }
 0x267   : > { %621 = vmax.xlane.f32.xlu0 %v1707_v6 }
 0x26f   : > { %627 = vmax.xlane.f32.xlu0 %v1711_v10 }
 0x270   : > { %499 = vperm.xlu1 %1334, %v391_v39   ;;  %v485_v39 = vpop.permute.xlu0 %484 }
 0x271   : > { %v523_v57 = vadd.f32 %v1687_v46, %v485_v39 }
 0x273   : > { %vm539_vm4 = vcmp.gt.f32.partialorder %v523_v57, 0.0 }
 0x278   : > { %v495_v44 = vpop.permute.xlu0 %494 }
 0x279   : > { %v525_v61 = vadd.f32 %v1687_v46, %v495_v44  ;;  %v199_v44 = vld [vmem:[%s1640_s5 + $0x78] sm:$0xff] }
 0x27a   : > { %vm592_vm12 = vcmp.gt.f32.partialorder %v199_v44, 0.0 }
 0x27b   : > { %v557_v0 = vmul.f32 0.2, %v525_v61  ;;  %vm541_vm6 = vcmp.gt.f32.partialorder %v525_v61, 0.0 }
 0x27d   : > { %v573_v2 = vsel %vm541_vm6, %v525_v61, %v557_v0 }
 0x29a   : > { %615 = vmax.xlane.f32.xlu1 %v1717_v17 }
 0x2a2   : > { %617 = vmax.xlane.f32.xlu1 %v1722_v23 }
 0x2aa   : > { %619 = vmax.xlane.f32.xlu1 %v1727_v29 }
 0x2b2   : > { %623 = vmax.xlane.f32.xlu1 %v1732_v35 }
 0x2ba   : > { %625 = vmax.xlane.f32.xlu1 %v1736_v42 }
 0x2ca   : > { %v612_v45 = vpop.xlane.xlu1 %611  ;;  %v610_v47 = vpop.xlane.xlu0 %609 }
 0x2cb   : > { %v642_v48 = vsub.f32 %v1694_v58, %v612_v45  ;;  %v641_v49 = vsub.f32 %v1696_v59, %v610_v47  ;;  %v555_v59 = vmul.f32 0.2, %v523_v57 }
 0x2cd   : > { %v659_v50 = vmul.f32 1.442695, %v642_v48  ;;  %v657_v51 = vmul.f32 1.442695, %v641_v49  ;;  %v571_v62 = vsel %vm539_vm4, %v523_v57, %v555_v59 }
 0x2ce   : > { %v1754_v63 = vsel %vm587_vm5, %v571_v62, -1e+30 }
 0x2cf   : > { %1339 = vpow2.f32 %v659_v50 }
 0x2d0   : > { %1341 = vpow2.f32 %v657_v51 }
 0x2d2   : > { %v614_v52 = vpop.xlane.xlu0 %613 }
 0x2d3   : > { %v643_v53 = vsub.f32 %v1702_v1, %v614_v52  ;;  %v196_v1 = vld [vmem:[%s1640_s5 + $0x60] sm:$0xff] }
 0x2d4   : > { %vm589_vm7 = vcmp.gt.f32.partialorder %v196_v1, 0.0 }
 0x2d5   : > { %v1742_v54 = vpop.eup %1339  ;;  %v661_v55 = vmul.f32 1.442695, %v643_v53  ;;  %v1759_v3 = vsel %vm589_vm7, %v573_v2, -1e+30 }
 0x2d6   : > { %v1744_v56 = vpop.eup %1341  ;;  %691 = vadd.xlane.f32.xlu2 %v1742_v54 }
 0x2d7   : > { %1343 = vpow2.f32 %v661_v55  ;;  %689 = vadd.xlane.f32.xlu0 %v1744_v56 }
 0x2da   : > { %v622_v8 = vpop.xlane.xlu0 %621 }
 0x2db   : > { %v647_v14 = vsub.f32 %v1707_v6, %v622_v8 }
 0x2dd   : > { %v1749_v58 = vpop.eup %1343  ;;  %v669_v15 = vmul.f32 1.442695, %v647_v14 }
 0x2de   : > { %693 = vadd.xlane.f32.xlu1 %v1749_v58 }
 0x2e2   : > { %v500_v4 = vpop.permute.xlu1 %499  ;;  %v628_v38 = vpop.xlane.xlu0 %627 }
 0x2e3   : > { %v526_v24 = vadd.f32 %v1687_v46, %v500_v4 }
 0x2e5   : > { %v558_v27 = vmul.f32 0.2, %v526_v24  ;;  %vm542_vm10 = vcmp.gt.f32.partialorder %v526_v24, 0.0 }
 0x2e6   : > { %629 = vmax.xlane.f32.xlu1 %v1754_v63 }
 0x2e7   : > { %v574_v32 = vsel %vm542_vm10, %v526_v24, %v558_v27 }
 0x2eb   : > { %504 = vperm.xlu0 %1333, %v1681_v40   ;;  %v572_v40 = vsel %vm540_vm8, %v524_v5, %v556_v11 }
 0x2ec   : > { %v1768_v18 = vsel %vm588_vm9, %v572_v40, -1e+30 }
 0x2ee   : > { %509 = vperm.xlu2 %1335, %v1684_v41   ;;  %633 = vmax.xlane.f32.xlu1 %v1759_v3 }
 0x30d   : > { %v616_v7 = vpop.xlane.xlu1 %615 }
 0x30e   : > { %v644_v9 = vsub.f32 %v1717_v17, %v616_v7 }
 0x310   : > { %v663_v12 = vmul.f32 1.442695, %v644_v9 }
 0x312   : > { %1345 = vpow2.f32 %v663_v12 }
 0x313   : > { %1347 = vpow2.f32 %v669_v15 }
 0x315   : > { %v618_v41 = vpop.xlane.xlu1 %617 }
 0x316   : > { %v645_v16 = vsub.f32 %v1722_v23, %v618_v41 }
 0x317   : > { %631 = vmax.xlane.f32.xlu2 %v1768_v18 }
 0x318   : > { %v1771_v19 = vpop.eup %1345  ;;  %v665_v17 = vmul.f32 1.442695, %v645_v16 }
 0x319   : > { %695 = vadd.xlane.f32.xlu0 %v1771_v19  ;;  %v1775_v21 = vpop.eup %1347 }
 0x31a   : > { %1349 = vpow2.f32 %v665_v17  ;;  %v650_v17 = vsub.f32 %v1711_v10, %v628_v38 }
 0x31d   : > { %v620_v6 = vpop.xlane.xlu1 %619 }
 0x31e   : > { %v646_v20 = vsub.f32 %v1727_v29, %v620_v6  ;;  %v197_v29 = vld [vmem:[%s1640_s5 + $0x68] sm:$0xff] }
 0x31f   : > { %vm590_vm11 = vcmp.gt.f32.partialorder %v197_v29, 0.0 }
 0x320   : > { %v1777_v22 = vpop.eup %1349  ;;  %v667_v23 = vmul.f32 1.442695, %v646_v20  ;;  %v1788_v36 = vsel %vm590_vm11, %v574_v32, -1e+30  ;;  %v198_v20 = vld [vmem:[%s1640_s5 + $0x70] sm:$0xff] }
 0x321   : > { %697 = vadd.xlane.f32.xlu1 %v1777_v22  ;;  %701 = vadd.xlane.f32.xlu0 %v1775_v21  ;;  %vm591_vm7 = vcmp.gt.f32.partialorder %v198_v20, 0.0 }
 0x322   : > { %1351 = vpow2.f32 %v667_v23 }
 0x325   : > { %v624_v25 = vpop.xlane.xlu1 %623 }
 0x326   : > { %v648_v28 = vsub.f32 %v1732_v35, %v624_v25 }
 0x328   : > { %v1782_v26 = vpop.eup %1351  ;;  %v671_v30 = vmul.f32 1.442695, %v648_v28 }
 0x329   : > { %699 = vadd.xlane.f32.xlu1 %v1782_v26 }
 0x32a   : > { %1353 = vpow2.f32 %v671_v30 }
 0x32d   : > { %v626_v31 = vpop.xlane.xlu1 %625 }
 0x32e   : > { %v649_v33 = vsub.f32 %v1736_v42, %v626_v31 }
 0x330   : > { %v673_v34 = vmul.f32 1.442695, %v649_v33  ;;  %v1791_v37 = vpop.eup %1353 }
 0x331   : > { %635 = vmax.xlane.f32.xlu1 %v1788_v36 }
 0x332   : > { %1355 = vpow2.f32 %v673_v34 }
 0x338   : > { %v1793_v35 = vpop.eup %1355 }
 0x339   : > { %705 = vadd.xlane.f32.xlu2 %v1793_v35  ;;  %703 = vadd.xlane.f32.xlu1 %v1791_v37 }
 0x349   : > { %v692_v39 = vpop.xlane.xlu2 %691 }
 0x34a   : > { %1357 = vrcp.f32 %v692_v39  ;;  %v690_v42 = vpop.xlane.xlu0 %689  ;;  %v747_v53 = vand.u32 2147483648, %v692_v39  ;;  %v745_v61 = vand.u32 2147483647, %v692_v39  ;;  %vm741_vm0 = vweird.f32 %v692_v39 }
 0x34b   : > { %1359 = vrcp.f32 %v690_v42  ;;  %v732_v60 = vand.u32 2147483648, %v690_v42  ;;  %v730_v1 = vand.u32 2147483647, %v690_v42  ;;  %vm726_vm1 = vweird.f32 %v690_v42 }
 0x34c   : > { %v748_v7 = vor.u32 1.1754944e-38, %v747_v53  ;;  %vm746_vm4 = vcmp.eq.f32.partialorder %v745_v61, 8.507059e+37 }
 0x34d   : > { %v733_v9 = vor.u32 1.1754944e-38, %v732_v60  ;;  %vm731_vm5 = vcmp.eq.f32.partialorder %v730_v1, 8.507059e+37 }
 0x350   : > { %v1358_v43 = vpop.eup %1357 }
 0x351   : > { %v1360_v45 = vpop.eup %1359  ;;  %v737_v47 = vmul.f32 %v1358_v43, %v692_v39  ;;  %v510_v48 = vpop.permute.xlu2 %509  ;;  %vm742_vm14 = vweird.f32 %v1358_v43 }
 0x352   : > { %v1798_v49 = vpop.xlane.xlu1 %693  ;;  %v722_v50 = vmul.f32 %v1360_v45, %v690_v42  ;;  %v528_v51 = vadd.f32 %v1687_v46, %v510_v48  ;;  %vm727_vm15 = vweird.f32 %v1360_v45  ;;  %vm743_vm2 = vmor %vm741_vm0, %vm742_vm14 }
 0x353   : > { %v738_v52 = vsub.f32 1.0, %v737_v47  ;;  %vm728_vm3 = vmor %vm726_vm1, %vm727_vm15  ;;  %vm756_vm9 = vweird.f32 %v1798_v49 }
 0x354   : > { %v723_v55 = vsub.f32 1.0, %v722_v50  ;;  %v560_v57 = vmul.f32 0.2, %v528_v51  ;;  %vm544_vm13 = vcmp.gt.f32.partialorder %v528_v51, 0.0  ;;  %v762_v50 = vand.u32 2147483648, %v1798_v49 }
 0x355   : > { %v739_v59 = vmul.f32 %v1358_v43, %v738_v52 }
 0x356   : > { %v724_v62 = vmul.f32 %v1360_v45, %v723_v55  ;;  %v576_v0 = vsel %vm544_vm13, %v528_v51, %v560_v57 }
 0x357   : > { %v1801_v2 = vsel %vm592_vm12, %v576_v0, -1e+30  ;;  %v740_v4 = vadd.f32 %v1358_v43, %v739_v59  ;;  %v763_v59 = vor.u32 1.1754944e-38, %v762_v50 }
 0x358   : > { %639 = vmax.xlane.f32.xlu1 %v1801_v2  ;;  %v725_v5 = vadd.f32 %v1360_v45, %v724_v62 }
 0x359   : > { %v744_v11 = vsel %vm743_vm2, %v1358_v43, %v740_v4 }
 0x35a   : > { %v630_v8 = vpop.xlane.xlu1 %629  ;;  %v729_v13 = vsel %vm728_vm3, %v1360_v45, %v725_v5  ;;  %v749_v14 = vsel %vm746_vm4, %v748_v7, %v744_v11 }
 0x35b   : > { %v651_v12 = vsub.f32 %v1754_v63, %v630_v8  ;;  %v734_v40 = vsel %vm731_vm5, %v733_v9, %v729_v13  ;;  %v750_v15 = vmul.f32 %v1742_v54, %v749_v14  ;;  %v675_v63 = vmul.f32 1.442695, %v650_v17 }
 0x35c   : > { %v735_v16 = vmul.f32 %v1744_v56, %v734_v40 }
 0x35d   : > { %v677_v41 = vmul.f32 1.442695, %v651_v12  ;;  %v505_v6 = vpop.permute.xlu0 %504 }
 0x35e   : > { %v527_v23 = vadd.f32 %v1687_v46, %v505_v6  ;;  %v961_v24 = vpack.c.bf16 %v750_v15, %v735_v16 }
 0x35f   : > { %1361 = vpow2.f32 %v677_v41 }
 0x360   : > { %v559_v25 = vmul.f32 0.2, %v527_v23  ;;  %986 = vmatmul.bf16.vlgmr.msra.gmra.mxu2 %v961_v24  ;;  %vm543_vm6 = vcmp.gt.f32.partialorder %v527_v23, 0.0  ;;  %1363 = vpow2.f32 %v675_v63 }
 0x362   : > { %v634_v27 = vpop.xlane.xlu1 %633  ;;  %v575_v28 = vsel %vm543_vm6, %v527_v23, %v559_v25 }
 0x363   : > { %v1810_v29 = vsel %vm591_vm7, %v575_v28, -1e+30  ;;  %v653_v10 = vsub.f32 %v1759_v3, %v634_v27 }
 0x364   : > { %637 = vmax.xlane.f32.xlu0 %v1810_v29 }
 0x365   : > { %v1812_v54 = vpop.eup %1361  ;;  %v681_v46 = vmul.f32 1.442695, %v653_v10 }
 0x366   : > { %709 = vadd.xlane.f32.xlu1 %v1812_v54  ;;  %v1817_v56 = vpop.eup %1363 }
 0x367   : > { %1365 = vpow2.f32 %v681_v46 }
 0x368   : > { %1367 = vrcp.f32 %v1798_v49 }
 0x36c   : > { %707 = vadd.xlane.f32.xlu0 %v1817_v56 }
 0x36d   : > { %v1820_v30 = vpop.eup %1365 }
 0x36e   : > { %v1368_v31 = vpop.eup %1367 }
 0x36f   : > { %v752_v32 = vmul.f32 %v1368_v31, %v1798_v49  ;;  %vm757_vm8 = vweird.f32 %v1368_v31 }
 0x370   : > { %vm758_vm10 = vmor %vm756_vm9, %vm757_vm8 }
 0x371   : > { %v753_v38 = vsub.f32 1.0, %v752_v32 }
 0x373   : > { %v754_v42 = vmul.f32 %v1368_v31, %v753_v38 }
 0x374   : > { %713 = vadd.xlane.f32.xlu0 %v1820_v30 }
 0x375   : > { %v755_v48 = vadd.f32 %v1368_v31, %v754_v42 }
 0x377   : > { %v759_v55 = vsel %vm758_vm10, %v1368_v31, %v755_v48 }
 0x38a   : > { %v632_v33 = vpop.xlane.xlu2 %631 }
 0x38b   : > { %v652_v3 = vsub.f32 %v1768_v18, %v632_v33  ;;  %v760_v18 = vand.u32 2147483647, %v1798_v49 }
 0x38c   : > { %v696_v34 = vpop.xlane.xlu0 %695 }
 0x38d   : > { %v679_v39 = vmul.f32 1.442695, %v652_v3  ;;  %1369 = vrcp.f32 %v696_v34  ;;  %v777_v53 = vand.u32 2147483648, %v696_v34  ;;  %v775_v57 = vand.u32 2147483647, %v696_v34 }
 0x38e   : > { %vm771_vm12 = vweird.f32 %v696_v34  ;;  %vm761_vm13 = vcmp.eq.f32.partialorder %v760_v18, 8.507059e+37 }
 0x38f   : > { %1371 = vpow2.f32 %v679_v39  ;;  %v764_v1 = vsel %vm761_vm13, %v763_v59, %v759_v55  ;;  %v778_v5 = vor.u32 1.1754944e-38, %v777_v53  ;;  %vm776_vm15 = vcmp.eq.f32.partialorder %v775_v57, 8.507059e+37 }
 0x390   : > { %v765_v9 = vmul.f32 %v1749_v58, %v764_v1 }
 0x393   : > { %v1370_v43 = vpop.eup %1369 }
 0x394   : > { %v767_v44 = vmul.f32 %v1370_v43, %v696_v34  ;;  %v698_v45 = vpop.xlane.xlu1 %697  ;;  %vm772_vm11 = vweird.f32 %v1370_v43  ;;  %v1832_v7 = vpop.xlane.xlu0 %701 }
 0x395   : > { %v1826_v47 = vpop.eup %1371  ;;  %1373 = vrcp.f32 %v698_v45  ;;  %vm773_vm14 = vmor %vm771_vm12, %vm772_vm11  ;;  %v792_v6 = vand.u32 2147483648, %v698_v45  ;;  %vm786_vm1 = vweird.f32 %v698_v45  ;;  %v790_v58 = vand.u32 2147483647, %v698_v45 }
 0x396   : > { %v768_v51 = vsub.f32 1.0, %v767_v44  ;;  %711 = vadd.xlane.f32.xlu2 %v1826_v47  ;;  %v822_v50 = vand.u32 2147483648, %v1832_v7  ;;  %vm816_vm9 = vweird.f32 %v1832_v7  ;;  %v820_v18 = vand.u32 2147483647, %v1832_v7 }
 0x397   : > { %v793_v28 = vor.u32 1.1754944e-38, %v792_v6  ;;  %vm791_vm5 = vcmp.eq.f32.partialorder %v790_v58, 8.507059e+37 }
 0x398   : > { %v769_v52 = vmul.f32 %v1370_v43, %v768_v51  ;;  %v823_v55 = vor.u32 1.1754944e-38, %v822_v50  ;;  %vm821_vm13 = vcmp.eq.f32.partialorder %v820_v18, 8.507059e+37 }
 0x39a   : > { %v770_v60 = vadd.f32 %v1370_v43, %v769_v52 }
 0x39b   : > { %v1374_v61 = vpop.eup %1373 }
 0x39c   : > { %v782_v62 = vmul.f32 %v1374_v61, %v698_v45  ;;  %v700_v0 = vpop.xlane.xlu1 %699  ;;  %v774_v4 = vsel %vm773_vm14, %v1370_v43, %v770_v60  ;;  %vm787_vm0 = vweird.f32 %v1374_v61 }
 0x39d   : > { %1375 = vrcp.f32 %v700_v0  ;;  %v779_v8 = vsel %vm776_vm15, %v778_v5, %v774_v4  ;;  %vm788_vm2 = vmor %vm786_vm1, %vm787_vm0  ;;  %v805_v27 = vand.u32 2147483647, %v700_v0  ;;  %vm801_vm4 = vweird.f32 %v700_v0 }
 0x39e   : > { %v783_v49 = vsub.f32 1.0, %v782_v62  ;;  %v780_v11 = vmul.f32 %v1771_v19, %v779_v8  ;;  %1377 = vrcp.f32 %v1832_v7  ;;  %v807_v19 = vand.u32 2147483648, %v700_v0 }
 0x39f   : > { %vm806_vm7 = vcmp.eq.f32.partialorder %v805_v27, 8.507059e+37 }
 0x3a0   : > { %v784_v12 = vmul.f32 %v1374_v61, %v783_v49  ;;  %v962_v13 = vpack.c.bf16 %v780_v11, %v765_v9  ;;  %v808_v32 = vor.u32 1.1754944e-38, %v807_v19 }
 0x3a2   : > { %991 = vmatmul.bf16.gmra.mxu2 %v962_v13  ;;  %v785_v16 = vadd.f32 %v1374_v61, %v784_v12 }
 0x3a3   : > { %v1376_v14 = vpop.eup %1375 }
 0x3a4   : > { %v797_v40 = vmul.f32 %v1376_v14, %v700_v0  ;;  %v636_v15 = vpop.xlane.xlu1 %635  ;;  %v1378_v17 = vpop.eup %1377  ;;  %vm802_vm3 = vweird.f32 %v1376_v14  ;;  %v789_v63 = vsel %vm788_vm2, %v1374_v61, %v785_v16 }
 0x3a5   : > { %v654_v41 = vsub.f32 %v1788_v36, %v636_v15  ;;  %v812_v25 = vmul.f32 %v1378_v17, %v1832_v7  ;;  %vm803_vm6 = vmor %vm801_vm4, %vm802_vm3  ;;  %v794_v46 = vsel %vm791_vm5, %v793_v28, %v789_v63  ;;  %vm817_vm8 = vweird.f32 %v1378_v17 }
 0x3a6   : > { %v798_v20 = vsub.f32 1.0, %v797_v40  ;;  %v795_v38 = vmul.f32 %v1777_v22, %v794_v46  ;;  %vm818_vm10 = vmor %vm816_vm9, %vm817_vm8 }
 0x3a7   : > { %v683_v23 = vmul.f32 1.442695, %v654_v41  ;;  %v813_v33 = vsub.f32 1.0, %v812_v25 }
 0x3a8   : > { %v799_v24 = vmul.f32 %v1376_v14, %v798_v20 }
 0x3a9   : > { %1379 = vpow2.f32 %v683_v23  ;;  %v814_v42 = vmul.f32 %v1378_v17, %v813_v33 }
 0x3aa   : > { %v800_v36 = vadd.f32 %v1376_v14, %v799_v24 }
 0x3ab   : > { %v815_v48 = vadd.f32 %v1378_v17, %v814_v42 }
 0x3ac   : > { %v704_v10 = vpop.xlane.xlu1 %703  ;;  %v804_v31 = vsel %vm803_vm6, %v1376_v14, %v800_v36  ;;  %v706_v8 = vpop.xlane.xlu2 %705 }
 0x3ad   : > { %1381 = vrcp.f32 %v704_v10  ;;  %v809_v3 = vsel %vm806_vm7, %v808_v32, %v804_v31  ;;  %v837_v52 = vand.u32 2147483648, %v704_v10  ;;  %v835_v53 = vand.u32 2147483647, %v704_v10 }
 0x3ae   : > { %v810_v39 = vmul.f32 %v1782_v26, %v809_v3  ;;  %v819_v26 = vsel %vm818_vm10, %v1378_v17, %v815_v48  ;;  %vm831_vm12 = vweird.f32 %v704_v10  ;;  %v852_v6 = vand.u32 2147483648, %v706_v8 }
 0x3af   : > { %v1839_v34 = vpop.eup %1379  ;;  %v824_v59 = vsel %vm821_vm13, %v823_v55, %v819_v26  ;;  %v838_v60 = vor.u32 1.1754944e-38, %v837_v52  ;;  %vm836_vm15 = vcmp.eq.f32.partialorder %v835_v53, 8.507059e+37  ;;  %vm846_vm1 = vweird.f32 %v706_v8 }
 0x3b0   : > { %715 = vadd.xlane.f32.xlu1 %v1839_v34  ;;  %v963_v43 = vpack.c.bf16 %v810_v39, %v795_v38  ;;  %v825_v0 = vmul.f32 %v1775_v21, %v824_v59  ;;  %v850_v23 = vand.u32 2147483647, %v706_v8  ;;  %v853_v25 = vor.u32 1.1754944e-38, %v852_v6 }
 0x3b2   : > { %996 = vmatmul.bf16.gmra.mxu2 %v963_v43  ;;  %vm851_vm5 = vcmp.eq.f32.partialorder %v850_v23, 8.507059e+37 }
 0x3b3   : > { %v1382_v44 = vpop.eup %1381 }
 0x3b4   : > { %v827_v45 = vmul.f32 %v1382_v44, %v704_v10  ;;  %vm832_vm11 = vweird.f32 %v1382_v44 }
 0x3b5   : > { %vm833_vm14 = vmor %vm831_vm12, %vm832_vm11 }
 0x3b6   : > { %v828_v51 = vsub.f32 1.0, %v827_v45 }
 0x3b8   : > { %v829_v22 = vmul.f32 %v1382_v44, %v828_v51 }
 0x3ba   : > { %v830_v57 = vadd.f32 %v1382_v44, %v829_v22 }
 0x3bc   : > { %v834_v61 = vsel %vm833_vm14, %v1382_v44, %v830_v57 }
 0x3bd   : > { %v839_v62 = vsel %vm836_vm15, %v838_v60, %v834_v61 }
 0x3be   : > { %v840_v1 = vmul.f32 %v1791_v37, %v839_v62 }
 0x3c0   : > { %v964_v4 = vpack.c.bf16 %v840_v1, %v825_v0 }
 0x3c2   : > { %1001 = vmatmul.bf16.gmra.mxu2 %v964_v4 }
 0x3cb   : > { %v640_v5 = vpop.xlane.xlu1 %639 }
 0x3cc   : > { %v656_v7 = vsub.f32 %v1801_v2, %v640_v5 }
 0x3ce   : > { %v687_v49 = vmul.f32 1.442695, %v656_v7 }
 0x3d0   : > { %1383 = vpow2.f32 %v687_v49 }
 0x3d1   : > { %1385 = vrcp.f32 %v706_v8 }
 0x3d6   : > { %v1850_v9 = vpop.eup %1383 }
 0x3d7   : > { %v638_v11 = vpop.xlane.xlu0 %637  ;;  %719 = vadd.xlane.f32.xlu0 %v1850_v9  ;;  %v1386_v12 = vpop.eup %1385 }
 0x3d8   : > { %v655_v13 = vsub.f32 %v1810_v29, %v638_v11  ;;  %v842_v14 = vmul.f32 %v1386_v12, %v706_v8  ;;  %vm847_vm0 = vweird.f32 %v1386_v12 }
 0x3d9   : > { %vm848_vm2 = vmor %vm846_vm1, %vm847_vm0  ;;  %v710_v33 = vpop.xlane.xlu1 %709 }
 0x3da   : > { %v685_v21 = vmul.f32 1.442695, %v655_v13  ;;  %v843_v37 = vsub.f32 1.0, %v842_v14  ;;  %v882_v50 = vand.u32 2147483648, %v710_v33  ;;  %vm876_vm9 = vweird.f32 %v710_v33 }
 0x3db   : > { %v880_v18 = vand.u32 2147483647, %v710_v33 }
 0x3dc   : > { %1387 = vpow2.f32 %v685_v21  ;;  %v844_v2 = vmul.f32 %v1386_v12, %v843_v37  ;;  %v883_v53 = vor.u32 1.1754944e-38, %v882_v50 }
 0x3dd   : > { %vm881_vm13 = vcmp.eq.f32.partialorder %v880_v18, 8.507059e+37 }
 0x3de   : > { %v845_v17 = vadd.f32 %v1386_v12, %v844_v2 }
 0x3df   : > { %v708_v40 = vpop.xlane.xlu0 %707 }
 0x3e0   : > { %1389 = vrcp.f32 %v708_v40  ;;  %v867_v29 = vand.u32 2147483648, %v708_v40  ;;  %v849_v24 = vsel %vm848_vm2, %v1386_v12, %v845_v17  ;;  %v865_v19 = vand.u32 2147483647, %v708_v40 }
 0x3e1   : > { %vm861_vm4 = vweird.f32 %v708_v40  ;;  %v854_v27 = vsel %vm851_vm5, %v853_v25, %v849_v24  ;;  %1391 = vrcp.f32 %v710_v33 }
 0x3e2   : > { %v1854_v15 = vpop.eup %1387  ;;  %v868_v28 = vor.u32 1.1754944e-38, %v867_v29  ;;  %vm866_vm7 = vcmp.eq.f32.partialorder %v865_v19, 8.507059e+37  ;;  %v855_v46 = vmul.f32 %v1793_v35, %v854_v27 }
 0x3e3   : > { %717 = vadd.xlane.f32.xlu2 %v1854_v15 }
 0x3e6   : > { %v1390_v41 = vpop.eup %1389 }
 0x3e7   : > { %v857_v16 = vmul.f32 %v1390_v41, %v708_v40  ;;  %vm862_vm3 = vweird.f32 %v1390_v41  ;;  %v1392_v3 = vpop.eup %1391  ;;  %v714_v51 = vpop.xlane.xlu0 %713 }
 0x3e8   : > { %vm863_vm6 = vmor %vm861_vm4, %vm862_vm3  ;;  %v872_v38 = vmul.f32 %v1392_v3, %v710_v33  ;;  %vm877_vm8 = vweird.f32 %v1392_v3  ;;  %v912_v21 = vand.u32 2147483648, %v714_v51  ;;  %vm906_vm1 = vweird.f32 %v714_v51 }
 0x3e9   : > { %v858_v20 = vsub.f32 1.0, %v857_v16  ;;  %vm878_vm10 = vmor %vm876_vm9, %vm877_vm8  ;;  %v910_v37 = vand.u32 2147483647, %v714_v51 }
 0x3ea   : > { %v873_v39 = vsub.f32 1.0, %v872_v38 }
 0x3eb   : > { %v859_v58 = vmul.f32 %v1390_v41, %v858_v20  ;;  %vm911_vm5 = vcmp.eq.f32.partialorder %v910_v37, 8.507059e+37 }
 0x3ec   : > { %v874_v43 = vmul.f32 %v1392_v3, %v873_v39 }
 0x3ed   : > { %v860_v63 = vadd.f32 %v1390_v41, %v859_v58 }
 0x3ee   : > { %v875_v48 = vadd.f32 %v1392_v3, %v874_v43 }
 0x3ef   : > { %v864_v36 = vsel %vm863_vm6, %v1390_v41, %v860_v63  ;;  %v913_v41 = vor.u32 1.1754944e-38, %v912_v21 }
 0x3f0   : > { %v869_v10 = vsel %vm866_vm7, %v868_v28, %v864_v36  ;;  %v879_v22 = vsel %vm878_vm10, %v1392_v3, %v875_v48 }
 0x3f1   : > { %v870_v31 = vmul.f32 %v1817_v56, %v869_v10  ;;  %v884_v57 = vsel %vm881_vm13, %v883_v53, %v879_v22 }
 0x3f2   : > { %v885_v62 = vmul.f32 %v1812_v54, %v884_v57 }
 0x3f3   : > { %v965_v32 = vpack.c.bf16 %v870_v31, %v855_v46 }
 0x3f5   : > { %1006 = vmatmul.bf16.gmra.mxu2 %v965_v32 }
 0x409   : > { %v712_v42 = vpop.xlane.xlu2 %711 }
 0x40a   : > { %1393 = vrcp.f32 %v712_v42  ;;  %v897_v56 = vand.u32 2147483648, %v712_v42  ;;  %v895_v26 = vand.u32 2147483647, %v712_v42  ;;  %vm891_vm12 = vweird.f32 %v712_v42 }
 0x40b   : > { %1395 = vrcp.f32 %v714_v51 }
 0x40c   : > { %v898_v59 = vor.u32 1.1754944e-38, %v897_v56  ;;  %vm896_vm15 = vcmp.eq.f32.partialorder %v895_v26, 8.507059e+37  ;;  %v1865_v56 = vpop.f32.mrf.mxu2 }
 0x410   : > { %v1394_v44 = vpop.eup %1393 }
 0x411   : > { %v887_v45 = vmul.f32 %v1394_v44, %v712_v42  ;;  %vm892_vm11 = vweird.f32 %v1394_v44  ;;  %v1396_v1 = vpop.eup %1395 }
 0x412   : > { %vm893_vm14 = vmor %vm891_vm12, %vm892_vm11  ;;  %v902_v5 = vmul.f32 %v1396_v1, %v714_v51  ;;  %vm907_vm0 = vweird.f32 %v1396_v1 }
 0x413   : > { %v888_v35 = vsub.f32 1.0, %v887_v45  ;;  %vm908_vm2 = vmor %vm906_vm1, %vm907_vm0 }
 0x414   : > { %v903_v7 = vsub.f32 1.0, %v902_v5 }
 0x415   : > { %v889_v52 = vmul.f32 %v1394_v44, %v888_v35 }
 0x416   : > { %v904_v8 = vmul.f32 %v1396_v1, %v903_v7 }
 0x417   : > { %v890_v55 = vadd.f32 %v1394_v44, %v889_v52  ;;  %v1867_v52 = vpop.f32.mrf.mxu2 }
 0x418   : > { %v905_v13 = vadd.f32 %v1396_v1, %v904_v8 }
 0x419   : > { %v894_v60 = vsel %vm893_vm14, %v1394_v44, %v890_v55 }
 0x41a   : > { %v899_v61 = vsel %vm896_vm15, %v898_v59, %v894_v60  ;;  %v909_v2 = vsel %vm908_vm2, %v1396_v1, %v905_v13 }
 0x41b   : > { %v900_v0 = vmul.f32 %v1826_v47, %v899_v61  ;;  %v914_v6 = vsel %vm911_vm5, %v913_v41, %v909_v2 }
 0x41c   : > { %v915_v29 = vmul.f32 %v1820_v30, %v914_v6 }
 0x41d   : > { %v966_v4 = vpack.c.bf16 %v900_v0, %v885_v62 }
 0x41f   : > { %1011 = vmatmul.bf16.gmra.mxu2 %v966_v4  ;;  %v1869_v4 = vld [vmem:[#allocation4 + $0x188] ss:$0 sm:$0xff] }
 0x423   : > { %v716_v49 = vpop.xlane.xlu1 %715 }
 0x424   : > { %1397 = vrcp.f32 %v716_v49  ;;  %v927_v40 = vand.u32 2147483648, %v716_v49  ;;  %v925_v47 = vand.u32 2147483647, %v716_v49  ;;  %vm921_vm4 = vweird.f32 %v716_v49 }
 0x425   : > { %v992_v22 = vpop.f32.mrf.mxu2 }
 0x426   : > { %v928_v17 = vor.u32 1.1754944e-38, %v927_v40  ;;  %vm926_vm7 = vcmp.eq.f32.partialorder %v925_v47, 8.507059e+37 }
 0x42a   : > { %v1398_v11 = vpop.eup %1397 }
 0x42b   : > { %v917_v12 = vmul.f32 %v1398_v11, %v716_v49  ;;  %vm922_vm3 = vweird.f32 %v1398_v11 }
 0x42c   : > { %vm923_vm6 = vmor %vm921_vm4, %vm922_vm3 }
 0x42d   : > { %v918_v14 = vsub.f32 1.0, %v917_v12  ;;  %v994_v26 = vpop.f32.mrf.mxu2 }
 0x42f   : > { %v919_v54 = vmul.f32 %v1398_v11, %v918_v14 }
 0x431   : > { %v920_v16 = vadd.f32 %v1398_v11, %v919_v54 }
 0x433   : > { %v924_v20 = vsel %vm923_vm6, %v1398_v11, %v920_v16 }
 0x434   : > { %v929_v23 = vsel %vm926_vm7, %v928_v17, %v924_v20 }
 0x435   : > { %v930_v58 = vmul.f32 %v1839_v34, %v929_v23  ;;  %v997_v53 = vpop.f32.mrf.mxu2 }
 0x437   : > { %v967_v24 = vpack.c.bf16 %v930_v58, %v915_v29 }
 0x439   : > { %1016 = vmatmul.bf16.gmra.mxu2 %v967_v24 }
 0x43d   : > { %v999_v55 = vpop.f32.mrf.mxu2 }
 0x445   : > { %v1002_v57 = vpop.f32.mrf.mxu2 }
 0x446   : > { %v1900_v24 = vadd.f32 %v1869_v4, %v1002_v57  ;;  %v1927_v57 = vadd.f32 %v1869_v4, %v1865_v56 }
 0x44a   : > { %v720_v19 = vpop.xlane.xlu0 %719 }
 0x44b   : > { %1399 = vrcp.f32 %v720_v19  ;;  %v957_v32 = vand.u32 2147483648, %v720_v19  ;;  %vm951_vm9 = vweird.f32 %v720_v19  ;;  %v955_v33 = vand.u32 2147483647, %v720_v19 }
 0x44d   : > { %v958_v42 = vor.u32 1.1754944e-38, %v957_v32  ;;  %vm956_vm12 = vcmp.eq.f32.partialorder %v955_v33, 8.507059e+37  ;;  %v1004_v59 = vpop.f32.mrf.mxu2  ;;  %v1049_v32 = vmin.f32 %v1900_v24, 0.0 }
 0x44e   : > { %v1896_v23 = vadd.f32 %v1869_v4, %v1004_v59 }
 0x451   : > { %v1400_v25 = vpop.eup %1399 }
 0x452   : > { %v947_v63 = vmul.f32 %v1400_v25, %v720_v19  ;;  %vm952_vm8 = vweird.f32 %v1400_v25 }
 0x453   : > { %vm953_vm10 = vmor %vm951_vm9, %vm952_vm8  ;;  %vm1034_vm8 = vcmp.gt.f32.partialorder %v1896_v23, 0.0  ;;  %vm1033_vm9 = vcmp.gt.f32.partialorder %v1900_v24, 0.0 }
 0x454   : > { %v948_v27 = vsub.f32 1.0, %v947_v63 }
 0x456   : > { %v718_v28 = vpop.xlane.xlu2 %717  ;;  %v949_v36 = vmul.f32 %v1400_v25, %v948_v27  ;;  %v1904_v27 = vadd.f32 %v1869_v4, %v999_v55 }
 0x457   : > { %1401 = vrcp.f32 %v718_v28  ;;  %v942_v34 = vand.u32 2147483648, %v718_v28  ;;  %v940_v38 = vand.u32 2147483647, %v718_v28  ;;  %vm936_vm13 = vweird.f32 %v718_v28 }
 0x458   : > { %v950_v46 = vadd.f32 %v1400_v25, %v949_v36 }
 0x459   : > { %v943_v44 = vor.u32 1.1754944e-38, %v942_v34  ;;  %vm941_vm15 = vcmp.eq.f32.partialorder %v940_v38, 8.507059e+37 }
 0x45a   : > { %v954_v39 = vsel %vm953_vm10, %v1400_v25, %v950_v46  ;;  %vm1032_vm10 = vcmp.gt.f32.partialorder %v1904_v27, 0.0 }
 0x45b   : > { %v959_v45 = vsel %vm956_vm12, %v958_v42, %v954_v39  ;;  %v1048_v39 = vmin.f32 %v1904_v27, 0.0 }
 0x45c   : > { %v960_v35 = vmul.f32 %v1850_v9, %v959_v45 }
 0x45d   : > { %v1402_v10 = vpop.eup %1401 }
 0x45e   : > { %v932_v31 = vmul.f32 %v1402_v10, %v718_v28  ;;  %vm937_vm11 = vweird.f32 %v1402_v10  ;;  %v1050_v28 = vmin.f32 %v1896_v23, 0.0 }
 0x45f   : > { %vm938_vm14 = vmor %vm936_vm13, %vm937_vm11 }
 0x460   : > { %v933_v30 = vsub.f32 1.0, %v932_v31  ;;  %v1908_v31 = vadd.f32 %v1869_v4, %v997_v53  ;;  %v1073_v42 = vmul.f32 1.442695, %v1050_v28 }
 0x462   : > { %v934_v3 = vmul.f32 %v1402_v10, %v933_v30  ;;  %v1912_v30 = vadd.f32 %v1869_v4, %v994_v26  ;;  %vm1031_vm11 = vcmp.gt.f32.partialorder %v1908_v31, 0.0 }
 0x464   : > { %v935_v43 = vadd.f32 %v1402_v10, %v934_v3  ;;  %v1046_v55 = vmin.f32 %v1912_v30, 0.0  ;;  %vm1030_vm12 = vcmp.gt.f32.partialorder %v1912_v30, 0.0 }
 0x466   : > { %v939_v48 = vsel %vm938_vm14, %v1402_v10, %v935_v43  ;;  %v1916_v43 = vadd.f32 %v1869_v4, %v992_v22  ;;  %v1069_v22 = vmul.f32 1.442695, %v1048_v39  ;;  %v217_v39 = vld [vmem:[%s1640_s5 + $0x108] sm:$0xff] }
 0x467   : > { %v944_v50 = vsel %vm941_vm15, %v943_v44, %v939_v48  ;;  %vm1027_vm15 = vcmp.gt.f32.partialorder %v1927_v57, 0.0 }
 0x468   : > { %v945_v51 = vmul.f32 %v1854_v15, %v944_v50  ;;  %v1047_v50 = vmin.f32 %v1908_v31, 0.0  ;;  %vm1029_vm13 = vcmp.gt.f32.partialorder %v1916_v43, 0.0 }
 0x46a   : > { %v968_v18 = vpack.c.bf16 %v960_v35, %v945_v51  ;;  %v1071_v51 = vmul.f32 1.442695, %v1049_v32  ;;  %v1921_v35 = vadd.f32 %v1869_v4, %v1867_v52  ;;  %v1045_v52 = vmin.f32 %v1916_v43, 0.0  ;;  %v216_v32 = vld [vmem:[%s1640_s5 + $0x100] sm:$0xff] }
 0x46c   : > { %1021 = vmatmul.bf16.gmra.mxu2 %v968_v18  ;;  %vm1028_vm14 = vcmp.gt.f32.partialorder %v1921_v35, 0.0 }
 0x478   : > { %v1007_v60 = vpop.f32.mrf.mxu2 }
 0x479   : > { %v1892_v16 = vadd.f32 %v1869_v4, %v1007_v60 }
 0x47b   : > { %v1051_v19 = vmin.f32 %v1892_v16, 0.0  ;;  %vm1035_vm7 = vcmp.gt.f32.partialorder %v1892_v16, 0.0 }
 0x47d   : > { %v1075_v33 = vmul.f32 1.442695, %v1051_v19 }
 0x480   : > { %v1009_v61 = vpop.f32.mrf.mxu2 }
 0x481   : > { %v1888_v47 = vadd.f32 %v1869_v4, %v1009_v61 }
 0x483   : > { %v1052_v29 = vmin.f32 %v1888_v47, 0.0  ;;  %vm1036_vm6 = vcmp.gt.f32.partialorder %v1888_v47, 0.0 }
 0x485   : > { %v1077_v36 = vmul.f32 1.442695, %v1052_v29 }
 0x4a2   : > { %v1012_v62 = vpop.f32.mrf.mxu2 }
 0x4a3   : > { %v1883_v21 = vadd.f32 %v1869_v4, %v1012_v62  ;;  %v1067_v62 = vmul.f32 1.442695, %v1047_v50  ;;  %v256_v50 = vld [vmem:[#allocation4 + $0x130] sm:$0xff] }
 0x4a5   : > { %v1053_v17 = vmin.f32 %v1883_v21, 0.0  ;;  %vm1037_vm5 = vcmp.gt.f32.partialorder %v1883_v21, 0.0 }
 0x4a7   : > { %v1079_v25 = vmul.f32 1.442695, %v1053_v17 }
 0x4aa   : > { %v1014_v0 = vpop.f32.mrf.mxu2 }
 0x4ab   : > { %v1880_v12 = vadd.f32 %v1869_v4, %v1014_v0 }
 0x4ad   : > { %v1054_v2 = vmin.f32 %v1880_v12, 0.0  ;;  %vm1038_vm4 = vcmp.gt.f32.partialorder %v1880_v12, 0.0 }
 0x4af   : > { %v1081_v58 = vmul.f32 1.442695, %v1054_v2 }
 0x4bc   : > { %v1017_v1 = vpop.f32.mrf.mxu2 }
 0x4bd   : > { %v1876_v49 = vadd.f32 %v1869_v4, %v1017_v1 }
 0x4bf   : > { %v1055_v14 = vmin.f32 %v1876_v49, 0.0  ;;  %vm1039_vm3 = vcmp.gt.f32.partialorder %v1876_v49, 0.0 }
 0x4c1   : > { %v1083_v6 = vmul.f32 1.442695, %v1055_v14 }
 0x4c4   : > { %v1019_v15 = vpop.f32.mrf.mxu2 }
 0x4c5   : > { %v1873_v7 = vadd.f32 %v1869_v4, %v1019_v15 }
 0x4c7   : > { %v1056_v11 = vmin.f32 %v1873_v7, 0.0  ;;  %vm1040_vm2 = vcmp.gt.f32.partialorder %v1873_v7, 0.0 }
 0x4c9   : > { %v1085_v54 = vmul.f32 1.442695, %v1056_v11  ;;  %v1063_v11 = vmul.f32 1.442695, %v1045_v52 }
 0x4ef   : > { %v1022_v9 = vpop.f32.mrf.mxu2 }
 0x4f0   : > { %v1023_v5 = vadd.f32 %v1869_v4, %v1022_v9  ;;  %v1044_v9 = vmin.f32 %v1921_v35, 0.0 }
 0x4f2   : > { %v1057_v8 = vmin.f32 %v1023_v5, 0.0  ;;  %vm1041_vm1 = vcmp.gt.f32.partialorder %v1023_v5, 0.0 }
 0x4f4   : > { %v1087_v37 = vmul.f32 1.442695, %v1057_v8  ;;  %v1043_v8 = vmin.f32 %v1927_v57, 0.0 }
 0x4f6   : > { %1403 = vpow2.f32 %v1087_v37  ;;  %v1061_v37 = vmul.f32 1.442695, %v1044_v9  ;;  %v1059_v2 = vmul.f32 1.442695, %v1043_v8 }
 0x4f7   : > { %v1024_v13 = vpop.f32.mrf.mxu2  ;;  %1405 = vpow2.f32 %v1085_v54 }
 0x4f8   : > { %v1025_v40 = vadd.f32 %v1869_v4, %v1024_v13 }
 0x4fa   : > { %v1058_v41 = vmin.f32 %v1025_v40, 0.0  ;;  %vm1042_vm0 = vcmp.gt.f32.partialorder %v1025_v40, 0.0 }
 0x4fc   : > { %v1089_v20 = vmul.f32 1.442695, %v1058_v41  ;;  %v1404_v63 = vpop.eup %1403 }
 0x4fd   : > { %v1406_v10 = vpop.eup %1405  ;;  %v1273_v3 = vadd.f32 -1.0, %v1404_v63 }
 0x4fe   : > { %1407 = vpow2.f32 %v1089_v20  ;;  %v1272_v45 = vadd.f32 -1.0, %v1406_v10 }
 0x4ff   : > { %1409 = vpow2.f32 %v1083_v6  ;;  %v1121_v18 = vsel %vm1041_vm1, %v1023_v5, %v1273_v3  ;;  %v1065_v5 = vmul.f32 1.442695, %v1046_v55  ;;  %v263_v3 = vld [vmem:[#allocation4 + $0x168] sm:$0xff]  ;;  %v250_v55 = vld [vmem:[#allocation4 + $0x100] sm:$0xff] }
 0x500   : > { %1411 = vpow2.f32 %v1081_v58  ;;  %v1120_v59 = vsel %vm1040_vm2, %v1873_v7, %v1272_v45  ;;  %v258_v45 = vld [vmem:[#allocation4 + $0x140] sm:$0xff] }
 0x501   : > { %1413 = vpow2.f32 %v1079_v25 }
 0x502   : > { %1415 = vpow2.f32 %v1077_v36 }
 0x503   : > { %1417 = vpow2.f32 %v1075_v33 }
 0x504   : > { %v1408_v46 = vpop.eup %1407  ;;  %1419 = vpow2.f32 %v1073_v42  ;;  %v261_v42 = vld [vmem:[#allocation4 + $0x158] sm:$0xff] }
 0x505   : > { %v1274_v34 = vadd.f32 -1.0, %v1408_v46  ;;  %v1410_v38 = vpop.eup %1409  ;;  %1421 = vpow2.f32 %v1071_v51  ;;  %v255_v51 = vld [vmem:[#allocation4 + $0x128] sm:$0xff] }
 0x506   : > { %v1412_v48 = vpop.eup %1411  ;;  %v1271_v26 = vadd.f32 -1.0, %v1410_v38  ;;  %1423 = vpow2.f32 %v1069_v22  ;;  %v262_v38 = vld [vmem:[#allocation4 + $0x160] sm:$0xff] }
 0x507   : > { %v1122_v44 = vsel %vm1042_vm0, %v1025_v40, %v1274_v34  ;;  %v1414_v53 = vpop.eup %1413  ;;  %v1270_v60 = vadd.f32 -1.0, %v1412_v48  ;;  %1425 = vpow2.f32 %v1067_v62  ;;  %v264_v34 = vld [vmem:[#allocation4 + $0x170] sm:$0xff]  ;;  %v257_v48 = vld [vmem:[#allocation4 + $0x138] sm:$0xff] }
 0x508   : > { %1123 = vmatpush.msra.mxu3 %v1122_v44  ;;  %v1416_v61 = vpop.eup %1415  ;;  %v1119_v0 = vsel %vm1039_vm3, %v1876_v49, %v1271_v26  ;;  %v1269_v1 = vadd.f32 -1.0, %v1414_v53  ;;  %1427 = vpow2.f32 %v1065_v5  ;;  %v259_v44 = vld [vmem:[#allocation4 + $0x148] sm:$0xff]  ;;  %v252_v26 = vld [vmem:[#allocation4 + $0x110] sm:$0xff] }
 0x509   : > { %v1418_v15 = vpop.eup %1417  ;;  %v1118_v56 = vsel %vm1038_vm4, %v1880_v12, %v1270_v60  ;;  %v1268_v4 = vadd.f32 -1.0, %v1416_v61  ;;  %1429 = vpow2.f32 %v1063_v11  ;;  %v251_v53 = vld [vmem:[#allocation4 + $0x108] sm:$0xff] }
 0x50a   : > { %1124 = vmatpush.msra.mxu3 %v1121_v18  ;;  %v1420_v7 = vpop.eup %1419  ;;  %v1117_v49 = vsel %vm1037_vm5, %v1883_v21, %v1269_v1  ;;  %v1267_v13 = vadd.f32 -1.0, %v1418_v15  ;;  %1431 = vpow2.f32 %v1061_v37  ;;  %v253_v18 = vld [vmem:[#allocation4 + $0x118] sm:$0xff] }
 0x50b   : > { %v1422_v14 = vpop.eup %1421  ;;  %v1116_v12 = vsel %vm1036_vm6, %v1888_v47, %v1268_v4  ;;  %v1266_v40 = vadd.f32 -1.0, %v1420_v7  ;;  %1433 = vpow2.f32 %v1059_v2 }
 0x50c   : > { %1125 = vmatpush.msra.mxu3 %v1120_v59  ;;  %v1424_v54 = vpop.eup %1423  ;;  %v1115_v41 = vsel %vm1035_vm7, %v1892_v16, %v1267_v13  ;;  %v1265_v17 = vadd.f32 -1.0, %v1422_v14  ;;  %v1338_v59 = vld [vmem:[#allocation4 + $0x190] ss:$0 sm:$0xff] }
 0x50d   : > { %v1426_v21 = vpop.eup %1425  ;;  %v1114_v6 = vsel %vm1034_vm8, %v1896_v23, %v1266_v40  ;;  %v1264_v20 = vadd.f32 -1.0, %v1424_v54 }
 0x50e   : > { %1126 = vmatpush.msra.mxu3 %v1119_v0  ;;  %v1428_v29 = vpop.eup %1427  ;;  %v1113_v47 = vsel %vm1033_vm9, %v1900_v24, %v1265_v17  ;;  %v1263_v58 = vadd.f32 -1.0, %v1426_v21 }
 0x50f   : > { %v1430_v19 = vpop.eup %1429  ;;  %v1112_v16 = vsel %vm1032_vm10, %v1904_v27, %v1264_v20  ;;  %v1262_v25 = vadd.f32 -1.0, %v1428_v29 }
 0x510   : > { %1127 = vmatpush.msra.mxu3 %v1118_v56  ;;  %v1432_v63 = vpop.eup %1431  ;;  %v1111_v23 = vsel %vm1031_vm11, %v1908_v31, %v1263_v58  ;;  %v1261_v28 = vadd.f32 -1.0, %v1430_v19 }
 0x511   : > { %v1434_v36 = vpop.eup %1433  ;;  %v1110_v24 = vsel %vm1030_vm12, %v1912_v30, %v1262_v25  ;;  %v1260_v10 = vadd.f32 -1.0, %v1432_v63  ;;  %v265_v30 = vld [vmem:[#allocation4 + $0x178] sm:$0xff] }
 0x512   : > { %1128 = vmatpush.msra.mxu3 %v1117_v49  ;;  %v1109_v27 = vsel %vm1029_vm13, %v1916_v43, %v1261_v28  ;;  %v1259_v46 = vadd.f32 -1.0, %v1434_v36  ;;  %v260_v43 = vld [vmem:[#allocation4 + $0x150] sm:$0xff] }
 0x513   : > { %v1108_v31 = vsel %vm1028_vm14, %v1921_v35, %v1260_v10  ;;  %v254_v35 = vld [vmem:[#allocation4 + $0x120] sm:$0xff] }
 0x514   : > { %1129 = vmatpush.msra.mxu3 %v1116_v12  ;;  %v1107_v33 = vsel %vm1027_vm15, %v1927_v57, %v1259_v46 }
 0x516   : > { %1130 = vmatpush.msra.mxu3 %v1115_v41 }
 0x518   : > { %1131 = vmatpush.msra.mxu3 %v1114_v6 }
 0x51a   : > { %1132 = vmatpush.msra.mxu3 %v1113_v47 }
 0x51c   : > { %1133 = vmatpush.msra.mxu3 %v1112_v16 }
 0x51e   : > { %1134 = vmatpush.msra.mxu3 %v1111_v23 }
 0x520   : > { %1135 = vmatpush.msra.mxu3 %v1110_v24 }
 0x522   : > { %1136 = vmatpush.msra.mxu3 %v1109_v27 }
 0x524   : > { %1137 = vmatpush.msra.mxu3 %v1108_v31 }
 0x526   : > { %1138 = vmatpush.msra.mxu3 %v1107_v33 }
 0x527   : > { %1139 = vmatmul.f32.vlgmr.msra.gmra.mxu3 %v216_v32 }
 0x528   : > { %1147 = vmatpush.msrb.mxu3 %v265_v30 }
 0x52a   : > { %1148 = vmatpush.msrb.mxu3 %v264_v34 }
 0x52c   : > { %1149 = vmatpush.msrb.mxu3 %v263_v3 }
 0x52e   : > { %1150 = vmatpush.msrb.mxu3 %v262_v38 }
 0x52f   : > { %1142 = vmatmul.f32.gmra.mxu3 %v217_v39 }
 0x530   : > { %1151 = vmatpush.msrb.mxu3 %v261_v42 }
 0x532   : > { %1152 = vmatpush.msrb.mxu3 %v260_v43 }
 0x534   : > { %1153 = vmatpush.msrb.mxu3 %v259_v44 }
 0x536   : > { %1154 = vmatpush.msrb.mxu3 %v258_v45 }
 0x538   : > { %1155 = vmatpush.msrb.mxu3 %v257_v48 }
 0x53a   : > { %1156 = vmatpush.msrb.mxu3 %v256_v50 }
 0x53c   : > { %1157 = vmatpush.msrb.mxu3 %v255_v51 }
 0x53e   : > { %1158 = vmatpush.msrb.mxu3 %v254_v35 }
 0x540   : > { %1159 = vmatpush.msrb.mxu3 %v253_v18 }
 0x542   : > { %1160 = vmatpush.msrb.mxu3 %v252_v26 }
 0x544   : > { %1161 = vmatpush.msrb.mxu3 %v251_v53 }
 0x546   : > { %1162 = vmatpush.msrb.mxu3 %v250_v55 }
 0x5aa   : > { %v1140_v22 = vpop.f32.mrf.mxu3 }
 0x5ab   : > { %1163 = vmatmul.f32.vlgmr.msrb.gmra.mxu3 %v1140_v22 }
 0x5b2   : > { %v1143_v57 = vpop.f32.mrf.mxu3 }
 0x5b3   : > { %1166 = vmatmul.f32.gmra.mxu3 %v1143_v57 }
 0x62e   : > { %v1164_v60 = vpop.f32.mrf.mxu3 }
 0x62f   : > { %v1165_v61 = vadd.f32 %v1338_v59, %v1164_v60 }
 0x631   : > { %1170 = vst [vmem:[%s182_s24] sm:$0xff] %v1165_v61 }
 0x636   : > { %v1167_v52 = vpop.f32.mrf.mxu3 }
 0x637   : > { %v1168_v62 = vadd.f32 %v1338_v59, %v1167_v52 }
 0x639   : > { %1171 = vst [vmem:[%s182_s24 + $0x8] sm:$0xff] %v1168_v62 }
 0x63a PF: > { %p13_p4 = scmp.ge.s32.totalorder %s1600_s22, 10   ;;  %s1986_s9 = smov %s1525_s10 }
 0x63b   : > { %s1987_s10 = smov %s1529_s11  ;;  %s1988_s11 = smov %s1613_s27 }
 0x63c   : > { %s1989_s12 = smov %s1600_s22  ;;  %15 = sbr.rel (!%p13_p4) target bundleno = 4 (0x4), region = 72 }
 0x641   :  { %1194 = vsyncpa [#allocation3], 1 }
 0x642   :  { %1196 = vsyncpa [#allocation3 + $0x1], 1 }
 0x643   :  { %1197 = vsyncpa [#allocation5], 1 }

</bundles_post_ra>
